<compile_context>
chip_gen: v6e
topology: v6e:2x2x1
jax: 0.10.0
libtpu: 0.0.40
codegen_flags: <defaults>
</compile_context>

<pallas_src>
import math
from functools import partial

import jax
import jax.numpy as jnp
from jax.experimental import pallas as pl
from jax.experimental.pallas import tpu as pltpu

MXU_DTYPE = jnp.bfloat16   # MXU inputs; accumulation / residual stream stay f32


def _tpu_defaults():
    """Generation-specific VMEM budget and linear-kernel tile sizes."""
    vmem_cap = 128 * 1024 * 1024
    try:
        vmem_cap = int(pltpu.get_tpu_info().vmem_capacity_bytes)
    except Exception:
        pass
    limit = min(110 * 1024 * 1024, (vmem_cap * 3) // 4)   # 96 MiB v5e/v6e, 48 MiB v7x
    rows = 512 if vmem_cap >= 128 * 1024 * 1024 else 256
    cols = 1024 if vmem_cap >= 128 * 1024 * 1024 else 512
    return limit, rows, cols


VMEM_LIMIT_BYTES, BLOCK_ROWS, BLOCK_COLS = _tpu_defaults()


def _round_up(x, m):
    return (x + m - 1) // m * m


def _recip(x):
    # EUP approx reciprocal: its own VLIW slot (softmax denominator only).
    return pl.reciprocal(x, approx=True) if hasattr(pl, "reciprocal") else 1.0 / x


def _row_tiling(m, max_tile, align=16):
    """Pick a row tile that divides m (avoid pad/slice HBM copies); pad only as fallback."""
    if m <= max_tile:
        return m, m
    t = (max_tile // align) * align
    while t >= align:
        if m % t == 0:
            return t, m
        t -= align
    return max_tile, _round_up(m, max_tile)


def _col_tiling(n, max_tile):
    if n <= max_tile:
        return n
    t = (max_tile // 128) * 128
    while t >= 128:
        if n % t == 0:
            return t
        t -= 128
    return n


# ----------------------------- Pallas kernels ------------------------------ #

def _fused_linear_kernel(*refs, ln, act, has_res, eps, n_in):
    """[LayerNorm ->] (rows, Din) @ (Din, Dout) + bias [-> ReLU] [+ residual]."""
    x_ref, w_ref, b_ref = refs[0], refs[1], refs[2]
    nxt = 3
    res_ref = None
    if has_res:
        res_ref = refs[nxt]
        nxt += 1
    o_ref = refs[nxt]
    nxt += 1
    xln_ref = refs[nxt] if ln else None

    if ln:
        # Compute LN once per row tile (column axis is "arbitrary" -> j==0 first),
        # cache the bf16 result and reuse it for every output column tile.
        @pl.when(pl.program_id(1) == 0)
        def _():
            xf = x_ref[...].astype(jnp.float32)
            mean = jnp.mean(xf, axis=-1, keepdims=True)
            diff = xf - mean
            # torch.std: unbiased (N-1); eps added to the std, not the variance.
            std = jnp.sqrt(jnp.sum(diff * diff, axis=-1, keepdims=True)
                           * (1.0 / (n_in - 1)))
            xln_ref[...] = (diff / (std + eps)).astype(xln_ref.dtype)  # alpha=1, bias=0
        x = xln_ref[...]
    else:
        x = x_ref[...].astype(MXU_DTYPE)

    y = jnp.dot(x, w_ref[...].astype(MXU_DTYPE), preferred_element_type=jnp.float32)
    y = y + b_ref[...].astype(jnp.float32)
    if act == "relu":
        y = jnp.maximum(y, 0.0)
    if has_res:
        y = y + res_ref[...].astype(jnp.float32)
    o_ref[...] = y.astype(o_ref.dtype)


def _attn_kernel(*refs, scale, h, dk, d, fused_qkv):
    """softmax(q k^T * scale + mask) v for all heads of one (batch, q-tile) step.

    Q/K/V column selection happens on the VMEM block (no wrapper HBM slicing);
    each head's context is stored to its output column slice immediately.
    """
    if fused_qkv:
        qkv_ref, m_ref, o_ref = refs
        q_ref = kv_ref = qkv_ref
        q_off, k_off, v_off = 0, d, 2 * d
    else:
        q_ref, kv_ref, m_ref, o_ref = refs
        q_off, k_off, v_off = 0, 0, d

    # Finite mask fill: same softmax when >=1 key kept, NaN-robust otherwise.
    mbias = jnp.where(m_ref[0] == 0, -1e30, 0.0).astype(jnp.float32)     # (1, Sk)

    for head in range(h):                       # per-head immediate store bounds live ranges
        lo = head * dk
        # Fold 1/sqrt(dk) into q once per head tile (not into the (Sq,Sk) scores).
        qh = (q_ref[0, :, q_off + lo:q_off + lo + dk].astype(jnp.float32)
              * scale).astype(MXU_DTYPE)                                  # (Sq, dk)
        kh = kv_ref[0, :, k_off + lo:k_off + lo + dk]                     # (Sk, dk)
        vh = kv_ref[0, :, v_off + lo:v_off + lo + dk]                     # (Sk, dk)
        s = jax.lax.dot_general(qh, kh, (((1,), (1,)), ((), ())),
                                preferred_element_type=jnp.float32)       # (Sq, Sk)
        s = s + mbias
        s = s - jnp.max(s, axis=-1, keepdims=True)
        e = jnp.exp(s)
        p = e * _recip(jnp.sum(e, axis=-1, keepdims=True))
        ctx = jnp.dot(p.astype(vh.dtype), vh,
                      preferred_element_type=jnp.float32)                 # (Sq, dk)
        o_ref[0, :, lo:lo + dk] = ctx.astype(o_ref.dtype)


# ------------------------------ Pallas wrappers ----------------------------- #

def fused_linear(x2d, w, b, *, ln=False, act="none", residual=None,
                 out_dtype=jnp.float32, eps=1e-6):
    m, d_in = x2d.shape
    d_out = w.shape[1]

    tm, m_pad = _row_tiling(m, BLOCK_ROWS)
    tn = _col_tiling(d_out, BLOCK_COLS)

    if m_pad != m:                                   # fallback only; normally avoided
        pad = ((0, m_pad - m), (0, 0))
        x2d = jnp.pad(x2d, pad)
        if residual is not None:
            residual = jnp.pad(residual, pad)

    has_res = residual is not None
    in_specs = [
        pl.BlockSpec((tm, d_in), lambda i, j: (i, 0)),
        pl.BlockSpec((d_in, tn), lambda i, j: (0, j)),
        pl.BlockSpec((1, tn), lambda i, j: (0, j)),
    ]
    args = [x2d, w, b]
    if has_res:
        in_specs.append(pl.BlockSpec((tm, tn), lambda i, j: (i, j)))
        args.append(residual)

    scratch = [pltpu.VMEM((tm, d_in), MXU_DTYPE)] if ln else []

    bytes_accessed = int(
        x2d.size * x2d.dtype.itemsize + w.size * w.dtype.itemsize
        + b.size * b.dtype.itemsize
        + (residual.size * residual.dtype.itemsize if has_res else 0)
        + m_pad * d_out * jnp.dtype(out_dtype).itemsize)
    cost = pl.CostEstimate(flops=2 * m_pad * d_in * d_out,
                           transcendentals=0,
                           bytes_accessed=bytes_accessed)

    # TODO(synk): add K-axis tiling (grid axis "arbitrary" + f32 accumulator)
    #   for the FFN w2 matmul when dff alone would exceed v7x's VMEM budget.
    out = pl.pallas_call(
        partial(_fused_linear_kernel, ln=ln, act=act, has_res=has_res,
                eps=eps, n_in=d_in),
        out_shape=jax.ShapeDtypeStruct((m_pad, d_out), out_dtype),
        grid=(m_pad // tm, d_out // tn),
        in_specs=in_specs,
        out_specs=pl.BlockSpec((tm, tn), lambda i, j: (i, j)),
        scratch_shapes=scratch,
        compiler_params=pltpu.CompilerParams(
            dimension_semantics=("parallel", "arbitrary"),   # arbitrary j: LN cache valid
            vmem_limit_bytes=VMEM_LIMIT_BYTES),
        cost_estimate=cost,
    )(*args)
    return out[:m] if m_pad != m else out


def self_attention_core(qkv, mask, h):
    """qkv: (B, S, 3D) fused projection; returns merged-head context (B, S, D)."""
    b, s, d3 = qkv.shape
    d = d3 // 3
    dk = d // h
    scale = 1.0 / math.sqrt(dk)
    mask3 = mask.reshape(b, 1, s).astype(jnp.int32)
    cost = pl.CostEstimate(
        flops=4 * b * h * s * s * dk, transcendentals=b * h * s * s,
        bytes_accessed=int(qkv.size * qkv.dtype.itemsize + mask3.size * 4
                           + b * s * d * jnp.dtype(qkv.dtype).itemsize))
    return pl.pallas_call(
        partial(_attn_kernel, scale=scale, h=h, dk=dk, d=d, fused_qkv=True),
        out_shape=jax.ShapeDtypeStruct((b, s, d), qkv.dtype),
        grid=(b,),
        in_specs=[pl.BlockSpec((1, s, d3), lambda i: (i, 0, 0)),
                  pl.BlockSpec((1, 1, s), lambda i: (i, 0, 0))],
        out_specs=pl.BlockSpec((1, s, d), lambda i: (i, 0, 0)),
        compiler_params=pltpu.CompilerParams(
            dimension_semantics=("parallel",),
            vmem_limit_bytes=VMEM_LIMIT_BYTES),
        cost_estimate=cost,
    )(qkv, mask3)


def cross_attention_core(q, kv, mask, h):
    """q: (B, Sq, D); kv: (B, Sk, 2D) fused K|V projection."""
    b, sq, d = q.shape
    sk = kv.shape[1]
    dk = d // h
    scale = 1.0 / math.sqrt(dk)
    tq, _ = _row_tiling(sq, 256, align=8)        # q/o tiled over Sq; K/V fetched once per b
    mask3 = mask.reshape(b, 1, sk).astype(jnp.int32)
    cost = pl.CostEstimate(
        flops=4 * b * h * sq * sk * dk, transcendentals=b * h * sq * sk,
        bytes_accessed=int(q.size * q.dtype.itemsize + kv.size * kv.dtype.itemsize
                           + mask3.size * 4 + b * sq * d * jnp.dtype(q.dtype).itemsize))
    return pl.pallas_call(
        partial(_attn_kernel, scale=scale, h=h, dk=dk, d=d, fused_qkv=False),
        out_shape=jax.ShapeDtypeStruct((b, sq, d), q.dtype),
        grid=(b, sq // tq),
        in_specs=[pl.BlockSpec((1, tq, d), lambda i, j: (i, j, 0)),
                  pl.BlockSpec((1, sk, 2 * d), lambda i, j: (i, 0, 0)),
                  pl.BlockSpec((1, 1, sk), lambda i, j: (i, 0, 0))],
        out_specs=pl.BlockSpec((1, tq, d), lambda i, j: (i, j, 0)),
        compiler_params=pltpu.CompilerParams(
            dimension_semantics=("parallel", "arbitrary"),
            vmem_limit_bytes=VMEM_LIMIT_BYTES),
        cost_estimate=cost,
    )(q, kv, mask3)


# ------------------------------- Sublayers ---------------------------------- #

def self_attention_block(p, x, mask, h):
    """x + W_o(Attention(W_qkv(LN(x)))) — LN and residual fused into the linears."""
    b, s, d = x.shape
    x2 = x.reshape(b * s, d)
    qkv = fused_linear(x2, p["wqkv"], p["bqkv"], ln=True, out_dtype=MXU_DTYPE)
    ctx = self_attention_core(qkv.reshape(b, s, 3 * d), mask, h)     # no HBM Q/K/V slices
    out = fused_linear(ctx.reshape(b * s, d), p["wo"], p["bo"],
                       residual=x2, out_dtype=jnp.float32)
    return out.reshape(b, s, d)


def cross_attention_block(p, x, enc, mask, h):
    """x + W_o(Attention(W_q(LN(x)), W_kv(enc))) — intended pre-norm semantics."""
    b, sq, d = x.shape
    sk = enc.shape[1]
    x2 = x.reshape(b * sq, d)
    e2 = enc.reshape(b * sk, d)
    q = fused_linear(x2, p["wq"], p["bq"], ln=True, out_dtype=MXU_DTYPE)
    kv = fused_linear(e2, p["wkv"], p["bkv"], out_dtype=MXU_DTYPE)
    ctx = cross_attention_core(q.reshape(b, sq, d), kv.reshape(b, sk, 2 * d), mask, h)
    out = fused_linear(ctx.reshape(b * sq, d), p["wo"], p["bo"],
                       residual=x2, out_dtype=jnp.float32)
    return out.reshape(b, sq, d)


def feed_forward_block(p, x):
    """x + W2(relu(W1(LN(x)))) — LN fused into W1, residual fused into W2."""
    b, s, d = x.shape
    x2 = x.reshape(b * s, d)
    hdn = fused_linear(x2, p["w1"], p["b1"], ln=True, act="relu", out_dtype=MXU_DTYPE)
    out = fused_linear(hdn, p["w2"], p["b2"], residual=x2, out_dtype=jnp.float32)
    return out.reshape(b, s, d)


def decoder_block(params, x, encoder_output, e_mask, d_mask, h):
    x = self_attention_block(params["self_attn"], x, d_mask, h)
    x = cross_attention_block(params["cross_attn"], x, encoder_output, e_mask, h)
    x = feed_forward_block(params["feed_fwd"], x)
    return x


# ------------------------------- Param setup -------------------------------- #

def init_linear_params(key, d_in, d_out):
    k1, k2 = jax.random.split(key)
    bound = 1.0 / math.sqrt(d_in)
    w = jax.random.uniform(k1, (d_in, d_out), jnp.float32, -bound, bound).astype(MXU_DTYPE)
    b = jax.random.uniform(k2, (1, d_out), jnp.float32, -bound, bound)
    return w, b


def init_self_attention_params(key, d_model):
    kqkv, ko = jax.random.split(key)
    wqkv, bqkv = init_linear_params(kqkv, d_model, 3 * d_model)   # fused Wq|Wk|Wv
    wo, bo = init_linear_params(ko, d_model, d_model)
    return {"wqkv": wqkv, "bqkv": bqkv, "wo": wo, "bo": bo}


def init_cross_attention_params(key, d_model):
    kq, kkv, ko = jax.random.split(key, 3)
    wq, bq = init_linear_params(kq, d_model, d_model)
    wkv, bkv = init_linear_params(kkv, d_model, 2 * d_model)      # fused Wk|Wv
    wo, bo = init_linear_params(ko, d_model, d_model)
    return {"wq": wq, "bq": bq, "wkv": wkv, "bkv": bkv, "wo": wo, "bo": bo}


def init_decoder_params(key, d_model, dff):
    k_self, k_cross, k_ff1, k_ff2 = jax.random.split(key, 4)
    w1, b1 = init_linear_params(k_ff1, d_model, dff)
    w2, b2 = init_linear_params(k_ff2, dff, d_model)
    return {
        "self_attn": init_self_attention_params(k_self, d_model),
        "cross_attn": init_cross_attention_params(k_cross, d_model),
        "feed_fwd": {"w1": w1, "b1": b1, "w2": w2, "b2": b2},
    }


# ----------------------------------- main ----------------------------------- #

if __name__ == "__main__":
    B, S_DEC, S_ENC, D_MODEL, H, DFF = 2, 8, 16, 32, 4, 64

    root = jax.random.PRNGKey(0)
    k_params, k_x, k_enc = jax.random.split(root, 3)

    params = init_decoder_params(k_params, D_MODEL, DFF)
    x = jax.random.normal(k_x, (B, S_DEC, D_MODEL), jnp.float32)
    encoder_output = jax.random.normal(k_enc, (B, S_ENC, D_MODEL), jnp.float32)

    # Padding masks (1 = keep, 0 = masked), at least one valid key per row.
    d_mask = (jnp.arange(S_DEC)[None, :] < jnp.array([S_DEC, S_DEC - 2])[:, None]
              ).astype(jnp.int32)                       # (B, S_DEC)
    e_mask = (jnp.arange(S_ENC)[None, :] < jnp.array([S_ENC, S_ENC - 5])[:, None]
              ).astype(jnp.int32)                       # (B, S_ENC)

    fwd = jax.jit(decoder_block, static_argnums=(5,))
    out = fwd(params, x, encoder_output, e_mask, d_mask, H)
    out = jax.block_until_ready(out)

    assert out.shape == (B, S_DEC, D_MODEL)
    assert bool(jnp.all(jnp.isfinite(out)))
    print("KERNEL_OK")
</pallas_src>

<mosaic_0001>
module attributes {stable_mosaic.version = 11 : i64} {
  func.func @_fused_linear_kernel(%arg0: i32, %arg1: i32, %arg2: memref<16x32xf32, #tpu.memory_space<vmem>>, %arg3: memref<32x32xbf16, #tpu.memory_space<vmem>>, %arg4: memref<1x32xf32, #tpu.memory_space<vmem>>, %arg5: memref<16x32xbf16, #tpu.memory_space<vmem>>, %arg6: memref<16x32xbf16, #tpu.memory_space<vmem>>) attributes {dimension_semantics = [#tpu.dimension_semantics<parallel>, #tpu.dimension_semantics<arbitrary>], iteration_bounds = array<i64: 1, 1>, scalar_prefetch = 0 : i64, scratch_operands = 1 : i64, tpu.core_type = #tpu.core_type<tc>, window_params = [{transform_indices = @transform_0, window_bounds = array<i64: 16, 32>}, {transform_indices = @transform_1, window_bounds = array<i64: 32, 32>}, {transform_indices = @transform_2, window_bounds = array<i64: 1, 32>}, {transform_indices = @transform_3, window_bounds = array<i64: 16, 32>}]} {
    %c0_i32 = arith.constant 0 : i32
    %0 = arith.cmpi eq, %arg1, %c0_i32 : i32
    %1 = arith.extui %0 : i1 to i32
    %c0_i32_0 = arith.constant 0 : i32
    %2 = arith.cmpi ne, %1, %c0_i32_0 : i32
    scf.if %2 {
      %c0_8 = arith.constant 0 : index
      %c0_9 = arith.constant 0 : index
      %11 = vector.load %arg2[%c0_8, %c0_9] : memref<16x32xf32, #tpu.memory_space<vmem>>, vector<16x32xf32>
      %cst_10 = arith.constant dense<0.000000e+00> : vector<16xf32>
      %12 = vector.multi_reduction <add>, %11, %cst_10 [1] : vector<16x32xf32> to vector<16xf32>
      %13 = vector.shape_cast %12 : vector<16xf32> to vector<16x1xf32>
      %cst_11 = arith.constant 3.200000e+01 : f32
      %14 = vector.broadcast %cst_11 : f32 to vector<16x1xf32>
      %15 = arith.divf %13, %14 : vector<16x1xf32>
      %16 = vector.broadcast %15 : vector<16x1xf32> to vector<16x32xf32>
      %17 = arith.subf %11, %16 : vector<16x32xf32>
      %18 = arith.mulf %17, %17 : vector<16x32xf32>
      %cst_12 = arith.constant dense<0.000000e+00> : vector<16xf32>
      %19 = vector.multi_reduction <add>, %18, %cst_12 [1] : vector<16x32xf32> to vector<16xf32>
      %20 = vector.shape_cast %19 : vector<16xf32> to vector<16x1xf32>
      %cst_13 = arith.constant 0.0322580636 : f32
      %21 = vector.broadcast %cst_13 : f32 to vector<16x1xf32>
      %22 = arith.mulf %20, %21 : vector<16x1xf32>
      %23 = math.sqrt %22 : vector<16x1xf32>
      %cst_14 = arith.constant 9.99999997E-7 : f32
      %24 = vector.broadcast %cst_14 : f32 to vector<16x1xf32>
      %25 = arith.addf %23, %24 : vector<16x1xf32>
      %26 = vector.broadcast %25 : vector<16x1xf32> to vector<16x32xf32>
      %27 = arith.divf %17, %26 : vector<16x32xf32>
      %28 = arith.truncf %27 : vector<16x32xf32> to vector<16x32xbf16>
      %c0_15 = arith.constant 0 : index
      %c0_16 = arith.constant 0 : index
      %29 = vector.load %arg6[%c0_15, %c0_16] : memref<16x32xbf16, #tpu.memory_space<vmem>>, vector<16x32xbf16>
      tpu.vector_store %arg6[%c0_15, %c0_16], %28 {strides = array<i32>} : memref<16x32xbf16, #tpu.memory_space<vmem>>, vector<16x32xbf16>,
    } else {
    }
    %c0 = arith.constant 0 : index
    %c0_1 = arith.constant 0 : index
    %3 = vector.load %arg6[%c0, %c0_1] : memref<16x32xbf16, #tpu.memory_space<vmem>>, vector<16x32xbf16>
    %c0_2 = arith.constant 0 : index
    %c0_3 = arith.constant 0 : index
    %4 = vector.load %arg3[%c0_2, %c0_3] : memref<32x32xbf16, #tpu.memory_space<vmem>>, vector<32x32xbf16>
    %cst = arith.constant dense<0.000000e+00> : vector<16x32xf32>
    %5 = tpu.matmul %3, %4, %cst {dimension_numbers = #tpu.dot_dimension_numbers<[1], [0], [0], [1], [0, 0, 1, 1], [], []>} : vector<16x32xbf16>, vector<32x32xbf16>, vector<16x32xf32> -> vector<16x32xf32>
    %c0_4 = arith.constant 0 : index
    %c0_5 = arith.constant 0 : index
    %6 = vector.load %arg4[%c0_4, %c0_5] : memref<1x32xf32, #tpu.memory_space<vmem>>, vector<1x32xf32>
    %7 = vector.broadcast %6 : vector<1x32xf32> to vector<16x32xf32>
    %8 = arith.addf %5, %7 : vector<16x32xf32>
    %9 = arith.truncf %8 : vector<16x32xf32> to vector<16x32xbf16>
    %c0_6 = arith.constant 0 : index
    %c0_7 = arith.constant 0 : index
    %10 = vector.load %arg5[%c0_6, %c0_7] : memref<16x32xbf16, #tpu.memory_space<vmem>>, vector<16x32xbf16>
    tpu.vector_store %arg5[%c0_6, %c0_7], %9 {strides = array<i32>} : memref<16x32xbf16, #tpu.memory_space<vmem>>, vector<16x32xbf16>,
    return
  }
  func.func @transform_0(%arg0: i32, %arg1: i32) -> (i32, i32) {
    %c0_i32 = arith.constant 0 : i32
    %c0_i32_0 = arith.constant 0 : i32
    return %arg0, %c0_i32 : i32, i32
  }
  func.func @transform_1(%arg0: i32, %arg1: i32) -> (i32, i32) {
    %c0_i32 = arith.constant 0 : i32
    %c0_i32_0 = arith.constant 0 : i32
    return %c0_i32, %arg1 : i32, i32
  }
  func.func @transform_2(%arg0: i32, %arg1: i32) -> (i32, i32) {
    %c0_i32 = arith.constant 0 : i32
    %c0_i32_0 = arith.constant 0 : i32
    return %c0_i32, %arg1 : i32, i32
  }
  func.func @transform_3(%arg0: i32, %arg1: i32) -> (i32, i32) {
    %c0_i32 = arith.constant 0 : i32
    return %arg0, %arg1 : i32, i32
  }
}

module attributes {stable_mosaic.version = 11 : i64} {
  func.func @_attn_kernel(%arg0: i32, %arg1: memref<1x8x96xbf16, #tpu.memory_space<vmem>>, %arg2: memref<1x1x8xi32, #tpu.memory_space<vmem>>, %arg3: memref<1x8x32xbf16, #tpu.memory_space<vmem>>) attributes {dimension_semantics = [#tpu.dimension_semantics<parallel>], iteration_bounds = array<i64: 2>, scalar_prefetch = 0 : i64, scratch_operands = 0 : i64, tpu.core_type = #tpu.core_type<tc>, window_params = [{transform_indices = @transform_0, window_bounds = array<i64: 1, 8, 96>}, {transform_indices = @transform_1, window_bounds = array<i64: 1, 1, 8>}, {transform_indices = @transform_2, window_bounds = array<i64: 1, 8, 32>}]} {
    %c0 = arith.constant 0 : index
    %c0_0 = arith.constant 0 : index
    %c0_1 = arith.constant 0 : index
    %0 = vector.load %arg2[%c0, %c0_0, %c0_1] : memref<1x1x8xi32, #tpu.memory_space<vmem>>, vector<1x1x8xi32>
    %1 = vector.shape_cast %0 : vector<1x1x8xi32> to vector<1x8xi32>
    %c0_i32 = arith.constant 0 : i32
    %2 = vector.broadcast %c0_i32 : i32 to vector<1x8xi32>
    %3 = arith.cmpi eq, %1, %2 : vector<1x8xi32>
    %cst = arith.constant -1.000000e+30 : f32
    %cst_2 = arith.constant 0.000000e+00 : f32
    %4 = vector.broadcast %cst : f32 to vector<1x8xf32>
    %5 = vector.broadcast %cst_2 : f32 to vector<1x8xf32>
    %6 = arith.select %3, %4, %5 : vector<1x8xi1>, vector<1x8xf32>
    %c0_3 = arith.constant 0 : index
    %c0_4 = arith.constant 0 : index
    %c0_5 = arith.constant 0 : index
    %7 = vector.load %arg1[%c0_3, %c0_4, %c0_5] : memref<1x8x96xbf16, #tpu.memory_space<vmem>>, vector<1x8x8xbf16>
    %8 = vector.shape_cast %7 : vector<1x8x8xbf16> to vector<8x8xbf16>
    %9 = arith.extf %8 : vector<8x8xbf16> to vector<8x8xf32>
    %cst_6 = arith.constant 0.353553385 : f32
    %10 = vector.broadcast %cst_6 : f32 to vector<8x8xf32>
    %11 = arith.mulf %9, %10 : vector<8x8xf32>
    %12 = arith.truncf %11 : vector<8x8xf32> to vector<8x8xbf16>
    %c0_7 = arith.constant 0 : index
    %c0_8 = arith.constant 0 : index
    %c32 = arith.constant 32 : index
    %13 = vector.load %arg1[%c0_7, %c0_8, %c32] : memref<1x8x96xbf16, #tpu.memory_space<vmem>>, vector<1x8x8xbf16>
    %14 = vector.shape_cast %13 : vector<1x8x8xbf16> to vector<8x8xbf16>
    %c0_9 = arith.constant 0 : index
    %c0_10 = arith.constant 0 : index
    %c64 = arith.constant 64 : index
    %15 = vector.load %arg1[%c0_9, %c0_10, %c64] : memref<1x8x96xbf16, #tpu.memory_space<vmem>>, vector<1x8x8xbf16>
    %16 = vector.shape_cast %15 : vector<1x8x8xbf16> to vector<8x8xbf16>
    %cst_11 = arith.constant dense<0.000000e+00> : vector<8x8xf32>
    %17 = tpu.matmul %12, %14, %cst_11 {dimension_numbers = #tpu.dot_dimension_numbers<[1], [1], [0], [0], [0, 0, 1, 0], [], []>} : vector<8x8xbf16>, vector<8x8xbf16>, vector<8x8xf32> -> vector<8x8xf32>
    %18 = vector.broadcast %6 : vector<1x8xf32> to vector<8x8xf32>
    %19 = arith.addf %17, %18 : vector<8x8xf32>
    %cst_12 = arith.constant dense<0xFF800000> : vector<8xf32>
    %20 = vector.multi_reduction <maximumf>, %19, %cst_12 [1] : vector<8x8xf32> to vector<8xf32>
    %21 = vector.shape_cast %20 : vector<8xf32> to vector<8x1xf32>
    %22 = vector.broadcast %21 : vector<8x1xf32> to vector<8x8xf32>
    %23 = arith.subf %19, %22 : vector<8x8xf32>
    %24 = math.exp %23 : vector<8x8xf32>
    %cst_13 = arith.constant dense<0.000000e+00> : vector<8xf32>
    %25 = vector.multi_reduction <add>, %24, %cst_13 [1] : vector<8x8xf32> to vector<8xf32>
    %26 = vector.shape_cast %25 : vector<8xf32> to vector<8x1xf32>
    %27 = tpu.reciprocal %26 {approx = true} : vector<8x1xf32> -> vector<8x1xf32>
    %28 = vector.broadcast %27 : vector<8x1xf32> to vector<8x8xf32>
    %29 = arith.mulf %24, %28 : vector<8x8xf32>
    %30 = arith.truncf %29 : vector<8x8xf32> to vector<8x8xbf16>
    %cst_14 = arith.constant dense<0.000000e+00> : vector<8x8xf32>
    %31 = tpu.matmul %30, %16, %cst_14 {dimension_numbers = #tpu.dot_dimension_numbers<[1], [0], [0], [1], [0, 0, 1, 1], [], []>} : vector<8x8xbf16>, vector<8x8xbf16>, vector<8x8xf32> -> vector<8x8xf32>
    %32 = arith.truncf %31 : vector<8x8xf32> to vector<8x8xbf16>
    %c0_15 = arith.constant 0 : index
    %c0_16 = arith.constant 0 : index
    %c0_17 = arith.constant 0 : index
    %33 = vector.load %arg3[%c0_15, %c0_16, %c0_17] : memref<1x8x32xbf16, #tpu.memory_space<vmem>>, vector<1x8x8xbf16>
    %34 = vector.shape_cast %33 : vector<1x8x8xbf16> to vector<8x8xbf16>
    %35 = vector.shape_cast %32 : vector<8x8xbf16> to vector<1x8x8xbf16>
    tpu.vector_store %arg3[%c0_15, %c0_16, %c0_17], %35 {strides = array<i32>} : memref<1x8x32xbf16, #tpu.memory_space<vmem>>, vector<1x8x8xbf16>,
    %c0_18 = arith.constant 0 : index
    %c0_19 = arith.constant 0 : index
    %c8 = arith.constant 8 : index
    %36 = vector.load %arg1[%c0_18, %c0_19, %c8] : memref<1x8x96xbf16, #tpu.memory_space<vmem>>, vector<1x8x8xbf16>
    %37 = vector.shape_cast %36 : vector<1x8x8xbf16> to vector<8x8xbf16>
    %38 = arith.extf %37 : vector<8x8xbf16> to vector<8x8xf32>
    %cst_20 = arith.constant 0.353553385 : f32
    %39 = vector.broadcast %cst_20 : f32 to vector<8x8xf32>
    %40 = arith.mulf %38, %39 : vector<8x8xf32>
    %41 = arith.truncf %40 : vector<8x8xf32> to vector<8x8xbf16>
    %c0_21 = arith.constant 0 : index
    %c0_22 = arith.constant 0 : index
    %c40 = arith.constant 40 : index
    %42 = vector.load %arg1[%c0_21, %c0_22, %c40] : memref<1x8x96xbf16, #tpu.memory_space<vmem>>, vector<1x8x8xbf16>
    %43 = vector.shape_cast %42 : vector<1x8x8xbf16> to vector<8x8xbf16>
    %c0_23 = arith.constant 0 : index
    %c0_24 = arith.constant 0 : index
    %c72 = arith.constant 72 : index
    %44 = vector.load %arg1[%c0_23, %c0_24, %c72] : memref<1x8x96xbf16, #tpu.memory_space<vmem>>, vector<1x8x8xbf16>
    %45 = vector.shape_cast %44 : vector<1x8x8xbf16> to vector<8x8xbf16>
    %cst_25 = arith.constant dense<0.000000e+00> : vector<8x8xf32>
    %46 = tpu.matmul %41, %43, %cst_25 {dimension_numbers = #tpu.dot_dimension_numbers<[1], [1], [0], [0], [0, 0, 1, 0], [], []>} : vector<8x8xbf16>, vector<8x8xbf16>, vector<8x8xf32> -> vector<8x8xf32>
    %47 = vector.broadcast %6 : vector<1x8xf32> to vector<8x8xf32>
    %48 = arith.addf %46, %47 : vector<8x8xf32>
    %cst_26 = arith.constant dense<0xFF800000> : vector<8xf32>
    %49 = vector.multi_reduction <maximumf>, %48, %cst_26 [1] : vector<8x8xf32> to vector<8xf32>
    %50 = vector.shape_cast %49 : vector<8xf32> to vector<8x1xf32>
    %51 = vector.broadcast %50 : vector<8x1xf32> to vector<8x8xf32>
    %52 = arith.subf %48, %51 : vector<8x8xf32>
    %53 = math.exp %52 : vector<8x8xf32>
    %cst_27 = arith.constant dense<0.000000e+00> : vector<8xf32>
    %54 = vector.multi_reduction <add>, %53, %cst_27 [1] : vector<8x8xf32> to vector<8xf32>
    %55 = vector.shape_cast %54 : vector<8xf32> to vector<8x1xf32>
    %56 = tpu.reciprocal %55 {approx = true} : vector<8x1xf32> -> vector<8x1xf32>
    %57 = vector.broadcast %56 : vector<8x1xf32> to vector<8x8xf32>
    %58 = arith.mulf %53, %57 : vector<8x8xf32>
    %59 = arith.truncf %58 : vector<8x8xf32> to vector<8x8xbf16>
    %cst_28 = arith.constant dense<0.000000e+00> : vector<8x8xf32>
    %60 = tpu.matmul %59, %45, %cst_28 {dimension_numbers = #tpu.dot_dimension_numbers<[1], [0], [0], [1], [0, 0, 1, 1], [], []>} : vector<8x8xbf16>, vector<8x8xbf16>, vector<8x8xf32> -> vector<8x8xf32>
    %61 = arith.truncf %60 : vector<8x8xf32> to vector<8x8xbf16>
    %c0_29 = arith.constant 0 : index
    %c0_30 = arith.constant 0 : index
    %c8_31 = arith.constant 8 : index
    %62 = vector.load %arg3[%c0_29, %c0_30, %c8_31] : memref<1x8x32xbf16, #tpu.memory_space<vmem>>, vector<1x8x8xbf16>
    %63 = vector.shape_cast %62 : vector<1x8x8xbf16> to vector<8x8xbf16>
    %64 = vector.shape_cast %61 : vector<8x8xbf16> to vector<1x8x8xbf16>
    tpu.vector_store %arg3[%c0_29, %c0_30, %c8_31], %64 {strides = array<i32>} : memref<1x8x32xbf16, #tpu.memory_space<vmem>>, vector<1x8x8xbf16>,
    %c0_32 = arith.constant 0 : index
    %c0_33 = arith.constant 0 : index
    %c16 = arith.constant 16 : index
    %65 = vector.load %arg1[%c0_32, %c0_33, %c16] : memref<1x8x96xbf16, #tpu.memory_space<vmem>>, vector<1x8x8xbf16>
    %66 = vector.shape_cast %65 : vector<1x8x8xbf16> to vector<8x8xbf16>
    %67 = arith.extf %66 : vector<8x8xbf16> to vector<8x8xf32>
    %cst_34 = arith.constant 0.353553385 : f32
    %68 = vector.broadcast %cst_34 : f32 to vector<8x8xf32>
    %69 = arith.mulf %67, %68 : vector<8x8xf32>
    %70 = arith.truncf %69 : vector<8x8xf32> to vector<8x8xbf16>
    %c0_35 = arith.constant 0 : index
    %c0_36 = arith.constant 0 : index
    %c48 = arith.constant 48 : index
    %71 = vector.load %arg1[%c0_35, %c0_36, %c48] : memref<1x8x96xbf16, #tpu.memory_space<vmem>>, vector<1x8x8xbf16>
    %72 = vector.shape_cast %71 : vector<1x8x8xbf16> to vector<8x8xbf16>
    %c0_37 = arith.constant 0 : index
    %c0_38 = arith.constant 0 : index
    %c80 = arith.constant 80 : index
    %73 = vector.load %arg1[%c0_37, %c0_38, %c80] : memref<1x8x96xbf16, #tpu.memory_space<vmem>>, vector<1x8x8xbf16>
    %74 = vector.shape_cast %73 : vector<1x8x8xbf16> to vector<8x8xbf16>
    %cst_39 = arith.constant dense<0.000000e+00> : vector<8x8xf32>
    %75 = tpu.matmul %70, %72, %cst_39 {dimension_numbers = #tpu.dot_dimension_numbers<[1], [1], [0], [0], [0, 0, 1, 0], [], []>} : vector<8x8xbf16>, vector<8x8xbf16>, vector<8x8xf32> -> vector<8x8xf32>
    %76 = vector.broadcast %6 : vector<1x8xf32> to vector<8x8xf32>
    %77 = arith.addf %75, %76 : vector<8x8xf32>
    %cst_40 = arith.constant dense<0xFF800000> : vector<8xf32>
    %78 = vector.multi_reduction <maximumf>, %77, %cst_40 [1] : vector<8x8xf32> to vector<8xf32>
    %79 = vector.shape_cast %78 : vector<8xf32> to vector<8x1xf32>
    %80 = vector.broadcast %79 : vector<8x1xf32> to vector<8x8xf32>
    %81 = arith.subf %77, %80 : vector<8x8xf32>
    %82 = math.exp %81 : vector<8x8xf32>
    %cst_41 = arith.constant dense<0.000000e+00> : vector<8xf32>
    %83 = vector.multi_reduction <add>, %82, %cst_41 [1] : vector<8x8xf32> to vector<8xf32>
    %84 = vector.shape_cast %83 : vector<8xf32> to vector<8x1xf32>
    %85 = tpu.reciprocal %84 {approx = true} : vector<8x1xf32> -> vector<8x1xf32>
    %86 = vector.broadcast %85 : vector<8x1xf32> to vector<8x8xf32>
    %87 = arith.mulf %82, %86 : vector<8x8xf32>
    %88 = arith.truncf %87 : vector<8x8xf32> to vector<8x8xbf16>
    %cst_42 = arith.constant dense<0.000000e+00> : vector<8x8xf32>
    %89 = tpu.matmul %88, %74, %cst_42 {dimension_numbers = #tpu.dot_dimension_numbers<[1], [0], [0], [1], [0, 0, 1, 1], [], []>} : vector<8x8xbf16>, vector<8x8xbf16>, vector<8x8xf32> -> vector<8x8xf32>
    %90 = arith.truncf %89 : vector<8x8xf32> to vector<8x8xbf16>
    %c0_43 = arith.constant 0 : index
    %c0_44 = arith.constant 0 : index
    %c16_45 = arith.constant 16 : index
    %91 = vector.load %arg3[%c0_43, %c0_44, %c16_45] : memref<1x8x32xbf16, #tpu.memory_space<vmem>>, vector<1x8x8xbf16>
    %92 = vector.shape_cast %91 : vector<1x8x8xbf16> to vector<8x8xbf16>
    %93 = vector.shape_cast %90 : vector<8x8xbf16> to vector<1x8x8xbf16>
    tpu.vector_store %arg3[%c0_43, %c0_44, %c16_45], %93 {strides = array<i32>} : memref<1x8x32xbf16, #tpu.memory_space<vmem>>, vector<1x8x8xbf16>,
    %c0_46 = arith.constant 0 : index
    %c0_47 = arith.constant 0 : index
    %c24 = arith.constant 24 : index
    %94 = vector.load %arg1[%c0_46, %c0_47, %c24] : memref<1x8x96xbf16, #tpu.memory_space<vmem>>, vector<1x8x8xbf16>
    %95 = vector.shape_cast %94 : vector<1x8x8xbf16> to vector<8x8xbf16>
    %96 = arith.extf %95 : vector<8x8xbf16> to vector<8x8xf32>
    %cst_48 = arith.constant 0.353553385 : f32
    %97 = vector.broadcast %cst_48 : f32 to vector<8x8xf32>
    %98 = arith.mulf %96, %97 : vector<8x8xf32>
    %99 = arith.truncf %98 : vector<8x8xf32> to vector<8x8xbf16>
    %c0_49 = arith.constant 0 : index
    %c0_50 = arith.constant 0 : index
    %c56 = arith.constant 56 : index
    %100 = vector.load %arg1[%c0_49, %c0_50, %c56] : memref<1x8x96xbf16, #tpu.memory_space<vmem>>, vector<1x8x8xbf16>
    %101 = vector.shape_cast %100 : vector<1x8x8xbf16> to vector<8x8xbf16>
    %c0_51 = arith.constant 0 : index
    %c0_52 = arith.constant 0 : index
    %c88 = arith.constant 88 : index
    %102 = vector.load %arg1[%c0_51, %c0_52, %c88] : memref<1x8x96xbf16, #tpu.memory_space<vmem>>, vector<1x8x8xbf16>
    %103 = vector.shape_cast %102 : vector<1x8x8xbf16> to vector<8x8xbf16>
    %cst_53 = arith.constant dense<0.000000e+00> : vector<8x8xf32>
    %104 = tpu.matmul %99, %101, %cst_53 {dimension_numbers = #tpu.dot_dimension_numbers<[1], [1], [0], [0], [0, 0, 1, 0], [], []>} : vector<8x8xbf16>, vector<8x8xbf16>, vector<8x8xf32> -> vector<8x8xf32>
    %105 = vector.broadcast %6 : vector<1x8xf32> to vector<8x8xf32>
    %106 = arith.addf %104, %105 : vector<8x8xf32>
    %cst_54 = arith.constant dense<0xFF800000> : vector<8xf32>
    %107 = vector.multi_reduction <maximumf>, %106, %cst_54 [1] : vector<8x8xf32> to vector<8xf32>
    %108 = vector.shape_cast %107 : vector<8xf32> to vector<8x1xf32>
    %109 = vector.broadcast %108 : vector<8x1xf32> to vector<8x8xf32>
    %110 = arith.subf %106, %109 : vector<8x8xf32>
    %111 = math.exp %110 : vector<8x8xf32>
    %cst_55 = arith.constant dense<0.000000e+00> : vector<8xf32>
    %112 = vector.multi_reduction <add>, %111, %cst_55 [1] : vector<8x8xf32> to vector<8xf32>
    %113 = vector.shape_cast %112 : vector<8xf32> to vector<8x1xf32>
    %114 = tpu.reciprocal %113 {approx = true} : vector<8x1xf32> -> vector<8x1xf32>
    %115 = vector.broadcast %114 : vector<8x1xf32> to vector<8x8xf32>
    %116 = arith.mulf %111, %115 : vector<8x8xf32>
    %117 = arith.truncf %116 : vector<8x8xf32> to vector<8x8xbf16>
    %cst_56 = arith.constant dense<0.000000e+00> : vector<8x8xf32>
    %118 = tpu.matmul %117, %103, %cst_56 {dimension_numbers = #tpu.dot_dimension_numbers<[1], [0], [0], [1], [0, 0, 1, 1], [], []>} : vector<8x8xbf16>, vector<8x8xbf16>, vector<8x8xf32> -> vector<8x8xf32>
    %119 = arith.truncf %118 : vector<8x8xf32> to vector<8x8xbf16>
    %c0_57 = arith.constant 0 : index
    %c0_58 = arith.constant 0 : index
    %c24_59 = arith.constant 24 : index
    %120 = vector.load %arg3[%c0_57, %c0_58, %c24_59] : memref<1x8x32xbf16, #tpu.memory_space<vmem>>, vector<1x8x8xbf16>
    %121 = vector.shape_cast %120 : vector<1x8x8xbf16> to vector<8x8xbf16>
    %122 = vector.shape_cast %119 : vector<8x8xbf16> to vector<1x8x8xbf16>
    tpu.vector_store %arg3[%c0_57, %c0_58, %c24_59], %122 {strides = array<i32>} : memref<1x8x32xbf16, #tpu.memory_space<vmem>>, vector<1x8x8xbf16>,
    return
  }
  func.func @transform_0(%arg0: i32) -> (i32, i32, i32) {
    %c0_i32 = arith.constant 0 : i32
    %c0_i32_0 = arith.constant 0 : i32
    %c0_i32_1 = arith.constant 0 : i32
    return %arg0, %c0_i32, %c0_i32_0 : i32, i32, i32
  }
  func.func @transform_1(%arg0: i32) -> (i32, i32, i32) {
    %c0_i32 = arith.constant 0 : i32
    %c0_i32_0 = arith.constant 0 : i32
    %c0_i32_1 = arith.constant 0 : i32
    return %arg0, %c0_i32, %c0_i32_0 : i32, i32, i32
  }
  func.func @transform_2(%arg0: i32) -> (i32, i32, i32) {
    %c0_i32 = arith.constant 0 : i32
    %c0_i32_0 = arith.constant 0 : i32
    %c0_i32_1 = arith.constant 0 : i32
    return %arg0, %c0_i32, %c0_i32_0 : i32, i32, i32
  }
}

module attributes {stable_mosaic.version = 11 : i64} {
  func.func @_fused_linear_kernel(%arg0: i32, %arg1: i32, %arg2: memref<16x32xbf16, #tpu.memory_space<vmem>>, %arg3: memref<32x32xbf16, #tpu.memory_space<vmem>>, %arg4: memref<1x32xf32, #tpu.memory_space<vmem>>, %arg5: memref<16x32xf32, #tpu.memory_space<vmem>>, %arg6: memref<16x32xf32, #tpu.memory_space<vmem>>) attributes {dimension_semantics = [#tpu.dimension_semantics<parallel>, #tpu.dimension_semantics<arbitrary>], iteration_bounds = array<i64: 1, 1>, scalar_prefetch = 0 : i64, scratch_operands = 0 : i64, tpu.core_type = #tpu.core_type<tc>, window_params = [{transform_indices = @transform_0, window_bounds = array<i64: 16, 32>}, {transform_indices = @transform_1, window_bounds = array<i64: 32, 32>}, {transform_indices = @transform_2, window_bounds = array<i64: 1, 32>}, {transform_indices = @transform_3, window_bounds = array<i64: 16, 32>}, {transform_indices = @transform_4, window_bounds = array<i64: 16, 32>}]} {
    %c0 = arith.constant 0 : index
    %c0_0 = arith.constant 0 : index
    %0 = vector.load %arg2[%c0, %c0_0] : memref<16x32xbf16, #tpu.memory_space<vmem>>, vector<16x32xbf16>
    %c0_1 = arith.constant 0 : index
    %c0_2 = arith.constant 0 : index
    %1 = vector.load %arg3[%c0_1, %c0_2] : memref<32x32xbf16, #tpu.memory_space<vmem>>, vector<32x32xbf16>
    %cst = arith.constant dense<0.000000e+00> : vector<16x32xf32>
    %2 = tpu.matmul %0, %1, %cst {dimension_numbers = #tpu.dot_dimension_numbers<[1], [0], [0], [1], [0, 0, 1, 1], [], []>} : vector<16x32xbf16>, vector<32x32xbf16>, vector<16x32xf32> -> vector<16x32xf32>
    %c0_3 = arith.constant 0 : index
    %c0_4 = arith.constant 0 : index
    %3 = vector.load %arg4[%c0_3, %c0_4] : memref<1x32xf32, #tpu.memory_space<vmem>>, vector<1x32xf32>
    %4 = vector.broadcast %3 : vector<1x32xf32> to vector<16x32xf32>
    %5 = arith.addf %2, %4 : vector<16x32xf32>
    %c0_5 = arith.constant 0 : index
    %c0_6 = arith.constant 0 : index
    %6 = vector.load %arg5[%c0_5, %c0_6] : memref<16x32xf32, #tpu.memory_space<vmem>>, vector<16x32xf32>
    %7 = arith.addf %5, %6 : vector<16x32xf32>
    %c0_7 = arith.constant 0 : index
    %c0_8 = arith.constant 0 : index
    %8 = vector.load %arg6[%c0_7, %c0_8] : memref<16x32xf32, #tpu.memory_space<vmem>>, vector<16x32xf32>
    tpu.vector_store %arg6[%c0_7, %c0_8], %7 {strides = array<i32>} : memref<16x32xf32, #tpu.memory_space<vmem>>, vector<16x32xf32>,
    return
  }
  func.func @transform_0(%arg0: i32, %arg1: i32) -> (i32, i32) {
    %c0_i32 = arith.constant 0 : i32
    %c0_i32_0 = arith.constant 0 : i32
    return %arg0, %c0_i32 : i32, i32
  }
  func.func @transform_1(%arg0: i32, %arg1: i32) -> (i32, i32) {
    %c0_i32 = arith.constant 0 : i32
    %c0_i32_0 = arith.constant 0 : i32
    return %c0_i32, %arg1 : i32, i32
  }
  func.func @transform_2(%arg0: i32, %arg1: i32) -> (i32, i32) {
    %c0_i32 = arith.constant 0 : i32
    %c0_i32_0 = arith.constant 0 : i32
    return %c0_i32, %arg1 : i32, i32
  }
  func.func @transform_3(%arg0: i32, %arg1: i32) -> (i32, i32) {
    %c0_i32 = arith.constant 0 : i32
    return %arg0, %arg1 : i32, i32
  }
  func.func @transform_4(%arg0: i32, %arg1: i32) -> (i32, i32) {
    %c0_i32 = arith.constant 0 : i32
    return %arg0, %arg1 : i32, i32
  }
}

module attributes {stable_mosaic.version = 11 : i64} {
  func.func @_fused_linear_kernel(%arg0: i32, %arg1: i32, %arg2: memref<16x32xf32, #tpu.memory_space<vmem>>, %arg3: memref<32x96xbf16, #tpu.memory_space<vmem>>, %arg4: memref<1x96xf32, #tpu.memory_space<vmem>>, %arg5: memref<16x96xbf16, #tpu.memory_space<vmem>>, %arg6: memref<16x32xbf16, #tpu.memory_space<vmem>>) attributes {dimension_semantics = [#tpu.dimension_semantics<parallel>, #tpu.dimension_semantics<arbitrary>], iteration_bounds = array<i64: 1, 1>, scalar_prefetch = 0 : i64, scratch_operands = 1 : i64, tpu.core_type = #tpu.core_type<tc>, window_params = [{transform_indices = @transform_0, window_bounds = array<i64: 16, 32>}, {transform_indices = @transform_1, window_bounds = array<i64: 32, 96>}, {transform_indices = @transform_2, window_bounds = array<i64: 1, 96>}, {transform_indices = @transform_3, window_bounds = array<i64: 16, 96>}]} {
    %c0_i32 = arith.constant 0 : i32
    %0 = arith.cmpi eq, %arg1, %c0_i32 : i32
    %1 = arith.extui %0 : i1 to i32
    %c0_i32_0 = arith.constant 0 : i32
    %2 = arith.cmpi ne, %1, %c0_i32_0 : i32
    scf.if %2 {
      %c0_8 = arith.constant 0 : index
      %c0_9 = arith.constant 0 : index
      %11 = vector.load %arg2[%c0_8, %c0_9] : memref<16x32xf32, #tpu.memory_space<vmem>>, vector<16x32xf32>
      %cst_10 = arith.constant dense<0.000000e+00> : vector<16xf32>
      %12 = vector.multi_reduction <add>, %11, %cst_10 [1] : vector<16x32xf32> to vector<16xf32>
      %13 = vector.shape_cast %12 : vector<16xf32> to vector<16x1xf32>
      %cst_11 = arith.constant 3.200000e+01 : f32
      %14 = vector.broadcast %cst_11 : f32 to vector<16x1xf32>
      %15 = arith.divf %13, %14 : vector<16x1xf32>
      %16 = vector.broadcast %15 : vector<16x1xf32> to vector<16x32xf32>
      %17 = arith.subf %11, %16 : vector<16x32xf32>
      %18 = arith.mulf %17, %17 : vector<16x32xf32>
      %cst_12 = arith.constant dense<0.000000e+00> : vector<16xf32>
      %19 = vector.multi_reduction <add>, %18, %cst_12 [1] : vector<16x32xf32> to vector<16xf32>
      %20 = vector.shape_cast %19 : vector<16xf32> to vector<16x1xf32>
      %cst_13 = arith.constant 0.0322580636 : f32
      %21 = vector.broadcast %cst_13 : f32 to vector<16x1xf32>
      %22 = arith.mulf %20, %21 : vector<16x1xf32>
      %23 = math.sqrt %22 : vector<16x1xf32>
      %cst_14 = arith.constant 9.99999997E-7 : f32
      %24 = vector.broadcast %cst_14 : f32 to vector<16x1xf32>
      %25 = arith.addf %23, %24 : vector<16x1xf32>
      %26 = vector.broadcast %25 : vector<16x1xf32> to vector<16x32xf32>
      %27 = arith.divf %17, %26 : vector<16x32xf32>
      %28 = arith.truncf %27 : vector<16x32xf32> to vector<16x32xbf16>
      %c0_15 = arith.constant 0 : index
      %c0_16 = arith.constant 0 : index
      %29 = vector.load %arg6[%c0_15, %c0_16] : memref<16x32xbf16, #tpu.memory_space<vmem>>, vector<16x32xbf16>
      tpu.vector_store %arg6[%c0_15, %c0_16], %28 {strides = array<i32>} : memref<16x32xbf16, #tpu.memory_space<vmem>>, vector<16x32xbf16>,
    } else {
    }
    %c0 = arith.constant 0 : index
    %c0_1 = arith.constant 0 : index
    %3 = vector.load %arg6[%c0, %c0_1] : memref<16x32xbf16, #tpu.memory_space<vmem>>, vector<16x32xbf16>
    %c0_2 = arith.constant 0 : index
    %c0_3 = arith.constant 0 : index
    %4 = vector.load %arg3[%c0_2, %c0_3] : memref<32x96xbf16, #tpu.memory_space<vmem>>, vector<32x96xbf16>
    %cst = arith.constant dense<0.000000e+00> : vector<16x96xf32>
    %5 = tpu.matmul %3, %4, %cst {dimension_numbers = #tpu.dot_dimension_numbers<[1], [0], [0], [1], [0, 0, 1, 1], [], []>} : vector<16x32xbf16>, vector<32x96xbf16>, vector<16x96xf32> -> vector<16x96xf32>
    %c0_4 = arith.constant 0 : index
    %c0_5 = arith.constant 0 : index
    %6 = vector.load %arg4[%c0_4, %c0_5] : memref<1x96xf32, #tpu.memory_space<vmem>>, vector<1x96xf32>
    %7 = vector.broadcast %6 : vector<1x96xf32> to vector<16x96xf32>
    %8 = arith.addf %5, %7 : vector<16x96xf32>
    %9 = arith.truncf %8 : vector<16x96xf32> to vector<16x96xbf16>
    %c0_6 = arith.constant 0 : index
    %c0_7 = arith.constant 0 : index
    %10 = vector.load %arg5[%c0_6, %c0_7] : memref<16x96xbf16, #tpu.memory_space<vmem>>, vector<16x96xbf16>
    tpu.vector_store %arg5[%c0_6, %c0_7], %9 {strides = array<i32>} : memref<16x96xbf16, #tpu.memory_space<vmem>>, vector<16x96xbf16>,
    return
  }
  func.func @transform_0(%arg0: i32, %arg1: i32) -> (i32, i32) {
    %c0_i32 = arith.constant 0 : i32
    %c0_i32_0 = arith.constant 0 : i32
    return %arg0, %c0_i32 : i32, i32
  }
  func.func @transform_1(%arg0: i32, %arg1: i32) -> (i32, i32) {
    %c0_i32 = arith.constant 0 : i32
    %c0_i32_0 = arith.constant 0 : i32
    return %c0_i32, %arg1 : i32, i32
  }
  func.func @transform_2(%arg0: i32, %arg1: i32) -> (i32, i32) {
    %c0_i32 = arith.constant 0 : i32
    %c0_i32_0 = arith.constant 0 : i32
    return %c0_i32, %arg1 : i32, i32
  }
  func.func @transform_3(%arg0: i32, %arg1: i32) -> (i32, i32) {
    %c0_i32 = arith.constant 0 : i32
    return %arg0, %arg1 : i32, i32
  }
}

module attributes {stable_mosaic.version = 11 : i64} {
  func.func @_fused_linear_kernel(%arg0: i32, %arg1: i32, %arg2: memref<32x32xf32, #tpu.memory_space<vmem>>, %arg3: memref<32x64xbf16, #tpu.memory_space<vmem>>, %arg4: memref<1x64xf32, #tpu.memory_space<vmem>>, %arg5: memref<32x64xbf16, #tpu.memory_space<vmem>>) attributes {dimension_semantics = [#tpu.dimension_semantics<parallel>, #tpu.dimension_semantics<arbitrary>], iteration_bounds = array<i64: 1, 1>, scalar_prefetch = 0 : i64, scratch_operands = 0 : i64, tpu.core_type = #tpu.core_type<tc>, window_params = [{transform_indices = @transform_0, window_bounds = array<i64: 32, 32>}, {transform_indices = @transform_1, window_bounds = array<i64: 32, 64>}, {transform_indices = @transform_2, window_bounds = array<i64: 1, 64>}, {transform_indices = @transform_3, window_bounds = array<i64: 32, 64>}]} {
    %c0 = arith.constant 0 : index
    %c0_0 = arith.constant 0 : index
    %0 = vector.load %arg2[%c0, %c0_0] : memref<32x32xf32, #tpu.memory_space<vmem>>, vector<32x32xf32>
    %1 = arith.truncf %0 : vector<32x32xf32> to vector<32x32xbf16>
    %c0_1 = arith.constant 0 : index
    %c0_2 = arith.constant 0 : index
    %2 = vector.load %arg3[%c0_1, %c0_2] : memref<32x64xbf16, #tpu.memory_space<vmem>>, vector<32x64xbf16>
    %cst = arith.constant dense<0.000000e+00> : vector<32x64xf32>
    %3 = tpu.matmul %1, %2, %cst {dimension_numbers = #tpu.dot_dimension_numbers<[1], [0], [0], [1], [0, 0, 1, 1], [], []>} : vector<32x32xbf16>, vector<32x64xbf16>, vector<32x64xf32> -> vector<32x64xf32>
    %c0_3 = arith.constant 0 : index
    %c0_4 = arith.constant 0 : index
    %4 = vector.load %arg4[%c0_3, %c0_4] : memref<1x64xf32, #tpu.memory_space<vmem>>, vector<1x64xf32>
    %5 = vector.broadcast %4 : vector<1x64xf32> to vector<32x64xf32>
    %6 = arith.addf %3, %5 : vector<32x64xf32>
    %7 = arith.truncf %6 : vector<32x64xf32> to vector<32x64xbf16>
    %c0_5 = arith.constant 0 : index
    %c0_6 = arith.constant 0 : index
    %8 = vector.load %arg5[%c0_5, %c0_6] : memref<32x64xbf16, #tpu.memory_space<vmem>>, vector<32x64xbf16>
    tpu.vector_store %arg5[%c0_5, %c0_6], %7 {strides = array<i32>} : memref<32x64xbf16, #tpu.memory_space<vmem>>, vector<32x64xbf16>,
    return
  }
  func.func @transform_0(%arg0: i32, %arg1: i32) -> (i32, i32) {
    %c0_i32 = arith.constant 0 : i32
    %c0_i32_0 = arith.constant 0 : i32
    return %arg0, %c0_i32 : i32, i32
  }
  func.func @transform_1(%arg0: i32, %arg1: i32) -> (i32, i32) {
    %c0_i32 = arith.constant 0 : i32
    %c0_i32_0 = arith.constant 0 : i32
    return %c0_i32, %arg1 : i32, i32
  }
  func.func @transform_2(%arg0: i32, %arg1: i32) -> (i32, i32) {
    %c0_i32 = arith.constant 0 : i32
    %c0_i32_0 = arith.constant 0 : i32
    return %c0_i32, %arg1 : i32, i32
  }
  func.func @transform_3(%arg0: i32, %arg1: i32) -> (i32, i32) {
    %c0_i32 = arith.constant 0 : i32
    return %arg0, %arg1 : i32, i32
  }
}

module attributes {stable_mosaic.version = 11 : i64} {
  func.func @_attn_kernel(%arg0: i32, %arg1: i32, %arg2: memref<1x8x32xbf16, #tpu.memory_space<vmem>>, %arg3: memref<1x16x64xbf16, #tpu.memory_space<vmem>>, %arg4: memref<1x1x16xi32, #tpu.memory_space<vmem>>, %arg5: memref<1x8x32xbf16, #tpu.memory_space<vmem>>) attributes {dimension_semantics = [#tpu.dimension_semantics<parallel>, #tpu.dimension_semantics<arbitrary>], iteration_bounds = array<i64: 2, 1>, scalar_prefetch = 0 : i64, scratch_operands = 0 : i64, tpu.core_type = #tpu.core_type<tc>, window_params = [{transform_indices = @transform_0, window_bounds = array<i64: 1, 8, 32>}, {transform_indices = @transform_1, window_bounds = array<i64: 1, 16, 64>}, {transform_indices = @transform_2, window_bounds = array<i64: 1, 1, 16>}, {transform_indices = @transform_3, window_bounds = array<i64: 1, 8, 32>}]} {
    %c0 = arith.constant 0 : index
    %c0_0 = arith.constant 0 : index
    %c0_1 = arith.constant 0 : index
    %0 = vector.load %arg4[%c0, %c0_0, %c0_1] : memref<1x1x16xi32, #tpu.memory_space<vmem>>, vector<1x1x16xi32>
    %1 = vector.shape_cast %0 : vector<1x1x16xi32> to vector<1x16xi32>
    %c0_i32 = arith.constant 0 : i32
    %2 = vector.broadcast %c0_i32 : i32 to vector<1x16xi32>
    %3 = arith.cmpi eq, %1, %2 : vector<1x16xi32>
    %cst = arith.constant -1.000000e+30 : f32
    %cst_2 = arith.constant 0.000000e+00 : f32
    %4 = vector.broadcast %cst : f32 to vector<1x16xf32>
    %5 = vector.broadcast %cst_2 : f32 to vector<1x16xf32>
    %6 = arith.select %3, %4, %5 : vector<1x16xi1>, vector<1x16xf32>
    %c0_3 = arith.constant 0 : index
    %c0_4 = arith.constant 0 : index
    %c0_5 = arith.constant 0 : index
    %7 = vector.load %arg2[%c0_3, %c0_4, %c0_5] : memref<1x8x32xbf16, #tpu.memory_space<vmem>>, vector<1x8x8xbf16>
    %8 = vector.shape_cast %7 : vector<1x8x8xbf16> to vector<8x8xbf16>
    %9 = arith.extf %8 : vector<8x8xbf16> to vector<8x8xf32>
    %cst_6 = arith.constant 0.353553385 : f32
    %10 = vector.broadcast %cst_6 : f32 to vector<8x8xf32>
    %11 = arith.mulf %9, %10 : vector<8x8xf32>
    %12 = arith.truncf %11 : vector<8x8xf32> to vector<8x8xbf16>
    %c0_7 = arith.constant 0 : index
    %c0_8 = arith.constant 0 : index
    %c0_9 = arith.constant 0 : index
    %13 = vector.load %arg3[%c0_7, %c0_8, %c0_9] : memref<1x16x64xbf16, #tpu.memory_space<vmem>>, vector<1x16x8xbf16>
    %14 = vector.shape_cast %13 : vector<1x16x8xbf16> to vector<16x8xbf16>
    %c0_10 = arith.constant 0 : index
    %c0_11 = arith.constant 0 : index
    %c32 = arith.constant 32 : index
    %15 = vector.load %arg3[%c0_10, %c0_11, %c32] : memref<1x16x64xbf16, #tpu.memory_space<vmem>>, vector<1x16x8xbf16>
    %16 = vector.shape_cast %15 : vector<1x16x8xbf16> to vector<16x8xbf16>
    %cst_12 = arith.constant dense<0.000000e+00> : vector<8x16xf32>
    %17 = tpu.matmul %12, %14, %cst_12 {dimension_numbers = #tpu.dot_dimension_numbers<[1], [1], [0], [0], [0, 0, 1, 0], [], []>} : vector<8x8xbf16>, vector<16x8xbf16>, vector<8x16xf32> -> vector<8x16xf32>
    %18 = vector.broadcast %6 : vector<1x16xf32> to vector<8x16xf32>
    %19 = arith.addf %17, %18 : vector<8x16xf32>
    %cst_13 = arith.constant dense<0xFF800000> : vector<8xf32>
    %20 = vector.multi_reduction <maximumf>, %19, %cst_13 [1] : vector<8x16xf32> to vector<8xf32>
    %21 = vector.shape_cast %20 : vector<8xf32> to vector<8x1xf32>
    %22 = vector.broadcast %21 : vector<8x1xf32> to vector<8x16xf32>
    %23 = arith.subf %19, %22 : vector<8x16xf32>
    %24 = math.exp %23 : vector<8x16xf32>
    %cst_14 = arith.constant dense<0.000000e+00> : vector<8xf32>
    %25 = vector.multi_reduction <add>, %24, %cst_14 [1] : vector<8x16xf32> to vector<8xf32>
    %26 = vector.shape_cast %25 : vector<8xf32> to vector<8x1xf32>
    %27 = tpu.reciprocal %26 {approx = true} : vector<8x1xf32> -> vector<8x1xf32>
    %28 = vector.broadcast %27 : vector<8x1xf32> to vector<8x16xf32>
    %29 = arith.mulf %24, %28 : vector<8x16xf32>
    %30 = arith.truncf %29 : vector<8x16xf32> to vector<8x16xbf16>
    %cst_15 = arith.constant dense<0.000000e+00> : vector<8x8xf32>
    %31 = tpu.matmul %30, %16, %cst_15 {dimension_numbers = #tpu.dot_dimension_numbers<[1], [0], [0], [1], [0, 0, 1, 1], [], []>} : vector<8x16xbf16>, vector<16x8xbf16>, vector<8x8xf32> -> vector<8x8xf32>
    %32 = arith.truncf %31 : vector<8x8xf32> to vector<8x8xbf16>
    %c0_16 = arith.constant 0 : index
    %c0_17 = arith.constant 0 : index
    %c0_18 = arith.constant 0 : index
    %33 = vector.load %arg5[%c0_16, %c0_17, %c0_18] : memref<1x8x32xbf16, #tpu.memory_space<vmem>>, vector<1x8x8xbf16>
    %34 = vector.shape_cast %33 : vector<1x8x8xbf16> to vector<8x8xbf16>
    %35 = vector.shape_cast %32 : vector<8x8xbf16> to vector<1x8x8xbf16>
    tpu.vector_store %arg5[%c0_16, %c0_17, %c0_18], %35 {strides = array<i32>} : memref<1x8x32xbf16, #tpu.memory_space<vmem>>, vector<1x8x8xbf16>,
    %c0_19 = arith.constant 0 : index
    %c0_20 = arith.constant 0 : index
    %c8 = arith.constant 8 : index
    %36 = vector.load %arg2[%c0_19, %c0_20, %c8] : memref<1x8x32xbf16, #tpu.memory_space<vmem>>, vector<1x8x8xbf16>
    %37 = vector.shape_cast %36 : vector<1x8x8xbf16> to vector<8x8xbf16>
    %38 = arith.extf %37 : vector<8x8xbf16> to vector<8x8xf32>
    %cst_21 = arith.constant 0.353553385 : f32
    %39 = vector.broadcast %cst_21 : f32 to vector<8x8xf32>
    %40 = arith.mulf %38, %39 : vector<8x8xf32>
    %41 = arith.truncf %40 : vector<8x8xf32> to vector<8x8xbf16>
    %c0_22 = arith.constant 0 : index
    %c0_23 = arith.constant 0 : index
    %c8_24 = arith.constant 8 : index
    %42 = vector.load %arg3[%c0_22, %c0_23, %c8_24] : memref<1x16x64xbf16, #tpu.memory_space<vmem>>, vector<1x16x8xbf16>
    %43 = vector.shape_cast %42 : vector<1x16x8xbf16> to vector<16x8xbf16>
    %c0_25 = arith.constant 0 : index
    %c0_26 = arith.constant 0 : index
    %c40 = arith.constant 40 : index
    %44 = vector.load %arg3[%c0_25, %c0_26, %c40] : memref<1x16x64xbf16, #tpu.memory_space<vmem>>, vector<1x16x8xbf16>
    %45 = vector.shape_cast %44 : vector<1x16x8xbf16> to vector<16x8xbf16>
    %cst_27 = arith.constant dense<0.000000e+00> : vector<8x16xf32>
    %46 = tpu.matmul %41, %43, %cst_27 {dimension_numbers = #tpu.dot_dimension_numbers<[1], [1], [0], [0], [0, 0, 1, 0], [], []>} : vector<8x8xbf16>, vector<16x8xbf16>, vector<8x16xf32> -> vector<8x16xf32>
    %47 = vector.broadcast %6 : vector<1x16xf32> to vector<8x16xf32>
    %48 = arith.addf %46, %47 : vector<8x16xf32>
    %cst_28 = arith.constant dense<0xFF800000> : vector<8xf32>
    %49 = vector.multi_reduction <maximumf>, %48, %cst_28 [1] : vector<8x16xf32> to vector<8xf32>
    %50 = vector.shape_cast %49 : vector<8xf32> to vector<8x1xf32>
    %51 = vector.broadcast %50 : vector<8x1xf32> to vector<8x16xf32>
    %52 = arith.subf %48, %51 : vector<8x16xf32>
    %53 = math.exp %52 : vector<8x16xf32>
    %cst_29 = arith.constant dense<0.000000e+00> : vector<8xf32>
    %54 = vector.multi_reduction <add>, %53, %cst_29 [1] : vector<8x16xf32> to vector<8xf32>
    %55 = vector.shape_cast %54 : vector<8xf32> to vector<8x1xf32>
    %56 = tpu.reciprocal %55 {approx = true} : vector<8x1xf32> -> vector<8x1xf32>
    %57 = vector.broadcast %56 : vector<8x1xf32> to vector<8x16xf32>
    %58 = arith.mulf %53, %57 : vector<8x16xf32>
    %59 = arith.truncf %58 : vector<8x16xf32> to vector<8x16xbf16>
    %cst_30 = arith.constant dense<0.000000e+00> : vector<8x8xf32>
    %60 = tpu.matmul %59, %45, %cst_30 {dimension_numbers = #tpu.dot_dimension_numbers<[1], [0], [0], [1], [0, 0, 1, 1], [], []>} : vector<8x16xbf16>, vector<16x8xbf16>, vector<8x8xf32> -> vector<8x8xf32>
    %61 = arith.truncf %60 : vector<8x8xf32> to vector<8x8xbf16>
    %c0_31 = arith.constant 0 : index
    %c0_32 = arith.constant 0 : index
    %c8_33 = arith.constant 8 : index
    %62 = vector.load %arg5[%c0_31, %c0_32, %c8_33] : memref<1x8x32xbf16, #tpu.memory_space<vmem>>, vector<1x8x8xbf16>
    %63 = vector.shape_cast %62 : vector<1x8x8xbf16> to vector<8x8xbf16>
    %64 = vector.shape_cast %61 : vector<8x8xbf16> to vector<1x8x8xbf16>
    tpu.vector_store %arg5[%c0_31, %c0_32, %c8_33], %64 {strides = array<i32>} : memref<1x8x32xbf16, #tpu.memory_space<vmem>>, vector<1x8x8xbf16>,
    %c0_34 = arith.constant 0 : index
    %c0_35 = arith.constant 0 : index
    %c16 = arith.constant 16 : index
    %65 = vector.load %arg2[%c0_34, %c0_35, %c16] : memref<1x8x32xbf16, #tpu.memory_space<vmem>>, vector<1x8x8xbf16>
    %66 = vector.shape_cast %65 : vector<1x8x8xbf16> to vector<8x8xbf16>
    %67 = arith.extf %66 : vector<8x8xbf16> to vector<8x8xf32>
    %cst_36 = arith.constant 0.353553385 : f32
    %68 = vector.broadcast %cst_36 : f32 to vector<8x8xf32>
    %69 = arith.mulf %67, %68 : vector<8x8xf32>
    %70 = arith.truncf %69 : vector<8x8xf32> to vector<8x8xbf16>
    %c0_37 = arith.constant 0 : index
    %c0_38 = arith.constant 0 : index
    %c16_39 = arith.constant 16 : index
    %71 = vector.load %arg3[%c0_37, %c0_38, %c16_39] : memref<1x16x64xbf16, #tpu.memory_space<vmem>>, vector<1x16x8xbf16>
    %72 = vector.shape_cast %71 : vector<1x16x8xbf16> to vector<16x8xbf16>
    %c0_40 = arith.constant 0 : index
    %c0_41 = arith.constant 0 : index
    %c48 = arith.constant 48 : index
    %73 = vector.load %arg3[%c0_40, %c0_41, %c48] : memref<1x16x64xbf16, #tpu.memory_space<vmem>>, vector<1x16x8xbf16>
    %74 = vector.shape_cast %73 : vector<1x16x8xbf16> to vector<16x8xbf16>
    %cst_42 = arith.constant dense<0.000000e+00> : vector<8x16xf32>
    %75 = tpu.matmul %70, %72, %cst_42 {dimension_numbers = #tpu.dot_dimension_numbers<[1], [1], [0], [0], [0, 0, 1, 0], [], []>} : vector<8x8xbf16>, vector<16x8xbf16>, vector<8x16xf32> -> vector<8x16xf32>
    %76 = vector.broadcast %6 : vector<1x16xf32> to vector<8x16xf32>
    %77 = arith.addf %75, %76 : vector<8x16xf32>
    %cst_43 = arith.constant dense<0xFF800000> : vector<8xf32>
    %78 = vector.multi_reduction <maximumf>, %77, %cst_43 [1] : vector<8x16xf32> to vector<8xf32>
    %79 = vector.shape_cast %78 : vector<8xf32> to vector<8x1xf32>
    %80 = vector.broadcast %79 : vector<8x1xf32> to vector<8x16xf32>
    %81 = arith.subf %77, %80 : vector<8x16xf32>
    %82 = math.exp %81 : vector<8x16xf32>
    %cst_44 = arith.constant dense<0.000000e+00> : vector<8xf32>
    %83 = vector.multi_reduction <add>, %82, %cst_44 [1] : vector<8x16xf32> to vector<8xf32>
    %84 = vector.shape_cast %83 : vector<8xf32> to vector<8x1xf32>
    %85 = tpu.reciprocal %84 {approx = true} : vector<8x1xf32> -> vector<8x1xf32>
    %86 = vector.broadcast %85 : vector<8x1xf32> to vector<8x16xf32>
    %87 = arith.mulf %82, %86 : vector<8x16xf32>
    %88 = arith.truncf %87 : vector<8x16xf32> to vector<8x16xbf16>
    %cst_45 = arith.constant dense<0.000000e+00> : vector<8x8xf32>
    %89 = tpu.matmul %88, %74, %cst_45 {dimension_numbers = #tpu.dot_dimension_numbers<[1], [0], [0], [1], [0, 0, 1, 1], [], []>} : vector<8x16xbf16>, vector<16x8xbf16>, vector<8x8xf32> -> vector<8x8xf32>
    %90 = arith.truncf %89 : vector<8x8xf32> to vector<8x8xbf16>
    %c0_46 = arith.constant 0 : index
    %c0_47 = arith.constant 0 : index
    %c16_48 = arith.constant 16 : index
    %91 = vector.load %arg5[%c0_46, %c0_47, %c16_48] : memref<1x8x32xbf16, #tpu.memory_space<vmem>>, vector<1x8x8xbf16>
    %92 = vector.shape_cast %91 : vector<1x8x8xbf16> to vector<8x8xbf16>
    %93 = vector.shape_cast %90 : vector<8x8xbf16> to vector<1x8x8xbf16>
    tpu.vector_store %arg5[%c0_46, %c0_47, %c16_48], %93 {strides = array<i32>} : memref<1x8x32xbf16, #tpu.memory_space<vmem>>, vector<1x8x8xbf16>,
    %c0_49 = arith.constant 0 : index
    %c0_50 = arith.constant 0 : index
    %c24 = arith.constant 24 : index
    %94 = vector.load %arg2[%c0_49, %c0_50, %c24] : memref<1x8x32xbf16, #tpu.memory_space<vmem>>, vector<1x8x8xbf16>
    %95 = vector.shape_cast %94 : vector<1x8x8xbf16> to vector<8x8xbf16>
    %96 = arith.extf %95 : vector<8x8xbf16> to vector<8x8xf32>
    %cst_51 = arith.constant 0.353553385 : f32
    %97 = vector.broadcast %cst_51 : f32 to vector<8x8xf32>
    %98 = arith.mulf %96, %97 : vector<8x8xf32>
    %99 = arith.truncf %98 : vector<8x8xf32> to vector<8x8xbf16>
    %c0_52 = arith.constant 0 : index
    %c0_53 = arith.constant 0 : index
    %c24_54 = arith.constant 24 : index
    %100 = vector.load %arg3[%c0_52, %c0_53, %c24_54] : memref<1x16x64xbf16, #tpu.memory_space<vmem>>, vector<1x16x8xbf16>
    %101 = vector.shape_cast %100 : vector<1x16x8xbf16> to vector<16x8xbf16>
    %c0_55 = arith.constant 0 : index
    %c0_56 = arith.constant 0 : index
    %c56 = arith.constant 56 : index
    %102 = vector.load %arg3[%c0_55, %c0_56, %c56] : memref<1x16x64xbf16, #tpu.memory_space<vmem>>, vector<1x16x8xbf16>
    %103 = vector.shape_cast %102 : vector<1x16x8xbf16> to vector<16x8xbf16>
    %cst_57 = arith.constant dense<0.000000e+00> : vector<8x16xf32>
    %104 = tpu.matmul %99, %101, %cst_57 {dimension_numbers = #tpu.dot_dimension_numbers<[1], [1], [0], [0], [0, 0, 1, 0], [], []>} : vector<8x8xbf16>, vector<16x8xbf16>, vector<8x16xf32> -> vector<8x16xf32>
    %105 = vector.broadcast %6 : vector<1x16xf32> to vector<8x16xf32>
    %106 = arith.addf %104, %105 : vector<8x16xf32>
    %cst_58 = arith.constant dense<0xFF800000> : vector<8xf32>
    %107 = vector.multi_reduction <maximumf>, %106, %cst_58 [1] : vector<8x16xf32> to vector<8xf32>
    %108 = vector.shape_cast %107 : vector<8xf32> to vector<8x1xf32>
    %109 = vector.broadcast %108 : vector<8x1xf32> to vector<8x16xf32>
    %110 = arith.subf %106, %109 : vector<8x16xf32>
    %111 = math.exp %110 : vector<8x16xf32>
    %cst_59 = arith.constant dense<0.000000e+00> : vector<8xf32>
    %112 = vector.multi_reduction <add>, %111, %cst_59 [1] : vector<8x16xf32> to vector<8xf32>
    %113 = vector.shape_cast %112 : vector<8xf32> to vector<8x1xf32>
    %114 = tpu.reciprocal %113 {approx = true} : vector<8x1xf32> -> vector<8x1xf32>
    %115 = vector.broadcast %114 : vector<8x1xf32> to vector<8x16xf32>
    %116 = arith.mulf %111, %115 : vector<8x16xf32>
    %117 = arith.truncf %116 : vector<8x16xf32> to vector<8x16xbf16>
    %cst_60 = arith.constant dense<0.000000e+00> : vector<8x8xf32>
    %118 = tpu.matmul %117, %103, %cst_60 {dimension_numbers = #tpu.dot_dimension_numbers<[1], [0], [0], [1], [0, 0, 1, 1], [], []>} : vector<8x16xbf16>, vector<16x8xbf16>, vector<8x8xf32> -> vector<8x8xf32>
    %119 = arith.truncf %118 : vector<8x8xf32> to vector<8x8xbf16>
    %c0_61 = arith.constant 0 : index
    %c0_62 = arith.constant 0 : index
    %c24_63 = arith.constant 24 : index
    %120 = vector.load %arg5[%c0_61, %c0_62, %c24_63] : memref<1x8x32xbf16, #tpu.memory_space<vmem>>, vector<1x8x8xbf16>
    %121 = vector.shape_cast %120 : vector<1x8x8xbf16> to vector<8x8xbf16>
    %122 = vector.shape_cast %119 : vector<8x8xbf16> to vector<1x8x8xbf16>
    tpu.vector_store %arg5[%c0_61, %c0_62, %c24_63], %122 {strides = array<i32>} : memref<1x8x32xbf16, #tpu.memory_space<vmem>>, vector<1x8x8xbf16>,
    return
  }
  func.func @transform_0(%arg0: i32, %arg1: i32) -> (i32, i32, i32) {
    %c0_i32 = arith.constant 0 : i32
    %c0_i32_0 = arith.constant 0 : i32
    return %arg0, %arg1, %c0_i32 : i32, i32, i32
  }
  func.func @transform_1(%arg0: i32, %arg1: i32) -> (i32, i32, i32) {
    %c0_i32 = arith.constant 0 : i32
    %c0_i32_0 = arith.constant 0 : i32
    %c0_i32_1 = arith.constant 0 : i32
    return %arg0, %c0_i32, %c0_i32_0 : i32, i32, i32
  }
  func.func @transform_2(%arg0: i32, %arg1: i32) -> (i32, i32, i32) {
    %c0_i32 = arith.constant 0 : i32
    %c0_i32_0 = arith.constant 0 : i32
    %c0_i32_1 = arith.constant 0 : i32
    return %arg0, %c0_i32, %c0_i32_0 : i32, i32, i32
  }
  func.func @transform_3(%arg0: i32, %arg1: i32) -> (i32, i32, i32) {
    %c0_i32 = arith.constant 0 : i32
    %c0_i32_0 = arith.constant 0 : i32
    return %arg0, %arg1, %c0_i32 : i32, i32, i32
  }
}

module attributes {stable_mosaic.version = 11 : i64} {
  func.func @_fused_linear_kernel(%arg0: i32, %arg1: i32, %arg2: memref<16x32xf32, #tpu.memory_space<vmem>>, %arg3: memref<32x64xbf16, #tpu.memory_space<vmem>>, %arg4: memref<1x64xf32, #tpu.memory_space<vmem>>, %arg5: memref<16x64xbf16, #tpu.memory_space<vmem>>, %arg6: memref<16x32xbf16, #tpu.memory_space<vmem>>) attributes {dimension_semantics = [#tpu.dimension_semantics<parallel>, #tpu.dimension_semantics<arbitrary>], iteration_bounds = array<i64: 1, 1>, scalar_prefetch = 0 : i64, scratch_operands = 1 : i64, tpu.core_type = #tpu.core_type<tc>, window_params = [{transform_indices = @transform_0, window_bounds = array<i64: 16, 32>}, {transform_indices = @transform_1, window_bounds = array<i64: 32, 64>}, {transform_indices = @transform_2, window_bounds = array<i64: 1, 64>}, {transform_indices = @transform_3, window_bounds = array<i64: 16, 64>}]} {
    %c0_i32 = arith.constant 0 : i32
    %0 = arith.cmpi eq, %arg1, %c0_i32 : i32
    %1 = arith.extui %0 : i1 to i32
    %c0_i32_0 = arith.constant 0 : i32
    %2 = arith.cmpi ne, %1, %c0_i32_0 : i32
    scf.if %2 {
      %c0_9 = arith.constant 0 : index
      %c0_10 = arith.constant 0 : index
      %13 = vector.load %arg2[%c0_9, %c0_10] : memref<16x32xf32, #tpu.memory_space<vmem>>, vector<16x32xf32>
      %cst_11 = arith.constant dense<0.000000e+00> : vector<16xf32>
      %14 = vector.multi_reduction <add>, %13, %cst_11 [1] : vector<16x32xf32> to vector<16xf32>
      %15 = vector.shape_cast %14 : vector<16xf32> to vector<16x1xf32>
      %cst_12 = arith.constant 3.200000e+01 : f32
      %16 = vector.broadcast %cst_12 : f32 to vector<16x1xf32>
      %17 = arith.divf %15, %16 : vector<16x1xf32>
      %18 = vector.broadcast %17 : vector<16x1xf32> to vector<16x32xf32>
      %19 = arith.subf %13, %18 : vector<16x32xf32>
      %20 = arith.mulf %19, %19 : vector<16x32xf32>
      %cst_13 = arith.constant dense<0.000000e+00> : vector<16xf32>
      %21 = vector.multi_reduction <add>, %20, %cst_13 [1] : vector<16x32xf32> to vector<16xf32>
      %22 = vector.shape_cast %21 : vector<16xf32> to vector<16x1xf32>
      %cst_14 = arith.constant 0.0322580636 : f32
      %23 = vector.broadcast %cst_14 : f32 to vector<16x1xf32>
      %24 = arith.mulf %22, %23 : vector<16x1xf32>
      %25 = math.sqrt %24 : vector<16x1xf32>
      %cst_15 = arith.constant 9.99999997E-7 : f32
      %26 = vector.broadcast %cst_15 : f32 to vector<16x1xf32>
      %27 = arith.addf %25, %26 : vector<16x1xf32>
      %28 = vector.broadcast %27 : vector<16x1xf32> to vector<16x32xf32>
      %29 = arith.divf %19, %28 : vector<16x32xf32>
      %30 = arith.truncf %29 : vector<16x32xf32> to vector<16x32xbf16>
      %c0_16 = arith.constant 0 : index
      %c0_17 = arith.constant 0 : index
      %31 = vector.load %arg6[%c0_16, %c0_17] : memref<16x32xbf16, #tpu.memory_space<vmem>>, vector<16x32xbf16>
      tpu.vector_store %arg6[%c0_16, %c0_17], %30 {strides = array<i32>} : memref<16x32xbf16, #tpu.memory_space<vmem>>, vector<16x32xbf16>,
    } else {
    }
    %c0 = arith.constant 0 : index
    %c0_1 = arith.constant 0 : index
    %3 = vector.load %arg6[%c0, %c0_1] : memref<16x32xbf16, #tpu.memory_space<vmem>>, vector<16x32xbf16>
    %c0_2 = arith.constant 0 : index
    %c0_3 = arith.constant 0 : index
    %4 = vector.load %arg3[%c0_2, %c0_3] : memref<32x64xbf16, #tpu.memory_space<vmem>>, vector<32x64xbf16>
    %cst = arith.constant dense<0.000000e+00> : vector<16x64xf32>
    %5 = tpu.matmul %3, %4, %cst {dimension_numbers = #tpu.dot_dimension_numbers<[1], [0], [0], [1], [0, 0, 1, 1], [], []>} : vector<16x32xbf16>, vector<32x64xbf16>, vector<16x64xf32> -> vector<16x64xf32>
    %c0_4 = arith.constant 0 : index
    %c0_5 = arith.constant 0 : index
    %6 = vector.load %arg4[%c0_4, %c0_5] : memref<1x64xf32, #tpu.memory_space<vmem>>, vector<1x64xf32>
    %7 = vector.broadcast %6 : vector<1x64xf32> to vector<16x64xf32>
    %8 = arith.addf %5, %7 : vector<16x64xf32>
    %cst_6 = arith.constant 0.000000e+00 : f32
    %9 = vector.broadcast %cst_6 : f32 to vector<16x64xf32>
    %10 = arith.maximumf %8, %9 : vector<16x64xf32>
    %11 = arith.truncf %10 : vector<16x64xf32> to vector<16x64xbf16>
    %c0_7 = arith.constant 0 : index
    %c0_8 = arith.constant 0 : index
    %12 = vector.load %arg5[%c0_7, %c0_8] : memref<16x64xbf16, #tpu.memory_space<vmem>>, vector<16x64xbf16>
    tpu.vector_store %arg5[%c0_7, %c0_8], %11 {strides = array<i32>} : memref<16x64xbf16, #tpu.memory_space<vmem>>, vector<16x64xbf16>,
    return
  }
  func.func @transform_0(%arg0: i32, %arg1: i32) -> (i32, i32) {
    %c0_i32 = arith.constant 0 : i32
    %c0_i32_0 = arith.constant 0 : i32
    return %arg0, %c0_i32 : i32, i32
  }
  func.func @transform_1(%arg0: i32, %arg1: i32) -> (i32, i32) {
    %c0_i32 = arith.constant 0 : i32
    %c0_i32_0 = arith.constant 0 : i32
    return %c0_i32, %arg1 : i32, i32
  }
  func.func @transform_2(%arg0: i32, %arg1: i32) -> (i32, i32) {
    %c0_i32 = arith.constant 0 : i32
    %c0_i32_0 = arith.constant 0 : i32
    return %c0_i32, %arg1 : i32, i32
  }
  func.func @transform_3(%arg0: i32, %arg1: i32) -> (i32, i32) {
    %c0_i32 = arith.constant 0 : i32
    return %arg0, %arg1 : i32, i32
  }
}

module attributes {stable_mosaic.version = 11 : i64} {
  func.func @_fused_linear_kernel(%arg0: i32, %arg1: i32, %arg2: memref<16x64xbf16, #tpu.memory_space<vmem>>, %arg3: memref<64x32xbf16, #tpu.memory_space<vmem>>, %arg4: memref<1x32xf32, #tpu.memory_space<vmem>>, %arg5: memref<16x32xf32, #tpu.memory_space<vmem>>, %arg6: memref<16x32xf32, #tpu.memory_space<vmem>>) attributes {dimension_semantics = [#tpu.dimension_semantics<parallel>, #tpu.dimension_semantics<arbitrary>], iteration_bounds = array<i64: 1, 1>, scalar_prefetch = 0 : i64, scratch_operands = 0 : i64, tpu.core_type = #tpu.core_type<tc>, window_params = [{transform_indices = @transform_0, window_bounds = array<i64: 16, 64>}, {transform_indices = @transform_1, window_bounds = array<i64: 64, 32>}, {transform_indices = @transform_2, window_bounds = array<i64: 1, 32>}, {transform_indices = @transform_3, window_bounds = array<i64: 16, 32>}, {transform_indices = @transform_4, window_bounds = array<i64: 16, 32>}]} {
    %c0 = arith.constant 0 : index
    %c0_0 = arith.constant 0 : index
    %0 = vector.load %arg2[%c0, %c0_0] : memref<16x64xbf16, #tpu.memory_space<vmem>>, vector<16x64xbf16>
    %c0_1 = arith.constant 0 : index
    %c0_2 = arith.constant 0 : index
    %1 = vector.load %arg3[%c0_1, %c0_2] : memref<64x32xbf16, #tpu.memory_space<vmem>>, vector<64x32xbf16>
    %cst = arith.constant dense<0.000000e+00> : vector<16x32xf32>
    %2 = tpu.matmul %0, %1, %cst {dimension_numbers = #tpu.dot_dimension_numbers<[1], [0], [0], [1], [0, 0, 1, 1], [], []>} : vector<16x64xbf16>, vector<64x32xbf16>, vector<16x32xf32> -> vector<16x32xf32>
    %c0_3 = arith.constant 0 : index
    %c0_4 = arith.constant 0 : index
    %3 = vector.load %arg4[%c0_3, %c0_4] : memref<1x32xf32, #tpu.memory_space<vmem>>, vector<1x32xf32>
    %4 = vector.broadcast %3 : vector<1x32xf32> to vector<16x32xf32>
    %5 = arith.addf %2, %4 : vector<16x32xf32>
    %c0_5 = arith.constant 0 : index
    %c0_6 = arith.constant 0 : index
    %6 = vector.load %arg5[%c0_5, %c0_6] : memref<16x32xf32, #tpu.memory_space<vmem>>, vector<16x32xf32>
    %7 = arith.addf %5, %6 : vector<16x32xf32>
    %c0_7 = arith.constant 0 : index
    %c0_8 = arith.constant 0 : index
    %8 = vector.load %arg6[%c0_7, %c0_8] : memref<16x32xf32, #tpu.memory_space<vmem>>, vector<16x32xf32>
    tpu.vector_store %arg6[%c0_7, %c0_8], %7 {strides = array<i32>} : memref<16x32xf32, #tpu.memory_space<vmem>>, vector<16x32xf32>,
    return
  }
  func.func @transform_0(%arg0: i32, %arg1: i32) -> (i32, i32) {
    %c0_i32 = arith.constant 0 : i32
    %c0_i32_0 = arith.constant 0 : i32
    return %arg0, %c0_i32 : i32, i32
  }
  func.func @transform_1(%arg0: i32, %arg1: i32) -> (i32, i32) {
    %c0_i32 = arith.constant 0 : i32
    %c0_i32_0 = arith.constant 0 : i32
    return %c0_i32, %arg1 : i32, i32
  }
  func.func @transform_2(%arg0: i32, %arg1: i32) -> (i32, i32) {
    %c0_i32 = arith.constant 0 : i32
    %c0_i32_0 = arith.constant 0 : i32
    return %c0_i32, %arg1 : i32, i32
  }
  func.func @transform_3(%arg0: i32, %arg1: i32) -> (i32, i32) {
    %c0_i32 = arith.constant 0 : i32
    return %arg0, %arg1 : i32, i32
  }
  func.func @transform_4(%arg0: i32, %arg1: i32) -> (i32, i32) {
    %c0_i32 = arith.constant 0 : i32
    return %arg0, %arg1 : i32, i32
  }
}

</mosaic_0001>

<bundles_post_ra>
// kernel: decoder_block.12
= control target key start
LH: loop header
LB: loop body
LE: loop exit
PB: predicated region body
PF: predicated region fallthrough
CT: control target
= control target key end

     0   :  { %vm21_vm0 = vcmask 261120   ;;  %v201_v15 = vmov 0.0   ;;  %vm202_vm1 = vmmov 0   ;;  %vm71_vm6 = vcmask 257024   ;;  %s253_s0 = inlined_call_operand.vmem [shape: f32[16,32], index: 0, kind: input, shape index: {}]   ;;  %s254_s1 = inlined_call_operand.vmem [shape: bf16[32,32], index: 1, kind: input, shape index: {}]   ;;  %s255_s2 = inlined_call_operand.vmem [shape: f32[1,32], index: 2, kind: input, shape index: {}]   ;;  %s256_s3 = inlined_call_operand.vmem [shape: bf16[16,32], index: 3, kind: output, shape index: {}]  }
   0x1   :  { %v19_v0 = vld [vmem:[%s253_s0] sm:$0xff]  ;;  %v20_v1 = vld [vmem:[%s253_s0 + $0x8] sm:$0xff]  ;;  %180 = vmatprep.subr.bf16.mxu0 %v201_v15  ;;  %184 = vmatprep.mubr.msk.bf16.mxu0 %vm202_vm1, %v201_v15 }
   0x2   :  { %v22_v2 = vsel %vm21_vm0, %v19_v0, 0.0  ;;  %v25_v3 = vsel %vm21_vm0, %v20_v1, 0.0  ;;  %v190_v14 = vld [vmem:[%s254_s1 + $0x8] sm:$0xff]   ;;  %v191_v16 = vld [vmem:[%s254_s1] sm:$0xff]  }
   0x3   :  { %23 = vadd.xlane.f32.xlu0 %v22_v2  ;;  %181 = vmatpush3.bf16.msra.mxu0 %v190_v14  ;;  %v166_v40 = vld [vmem:[%s255_s2] ss:$0 sm:$0xff] }
   0x4   :  { %182 = vmatprep.subr.bf16.mxu0 %v201_v15 }
   0x7   :  { %26 = vadd.xlane.f32.xlu0 %v25_v3  ;;  %183 = vmatpush3.bf16.msra.mxu0 %v191_v16 }
  0x8c   :  { %v24_v4 = vpop.xlane.xlu0 %23 }
  0x8d   :  { %v29_v5 = vmul.f32 0.03125, %v24_v4 }
  0x8f   :  { %v31_v6 = vsub.f32 %v19_v0, %v29_v5 }
  0x90   :  { %v27_v7 = vpop.xlane.xlu0 %26 }
  0x91   :  { %v30_v8 = vmul.f32 0.03125, %v27_v7  ;;  %v33_v9 = vmul.f32 %v31_v6, %v31_v6 }
  0x93   :  { %v32_v10 = vsub.f32 %v20_v1, %v30_v8  ;;  %v35_v11 = vsel %vm21_vm0, %v33_v9, 0.0 }
  0x94   :  { %36 = vadd.xlane.f32.xlu1 %v35_v11 }
  0x95   :  { %v34_v12 = vmul.f32 %v32_v10, %v32_v10 }
  0x97   :  { %v38_v13 = vsel %vm21_vm0, %v34_v12, 0.0 }
  0x98   :  { %39 = vadd.xlane.f32.xlu1 %v38_v13 }
 0x11d   :  { %v37_v17 = vpop.xlane.xlu1 %36 }
 0x11e   :  { %v41_v18 = vmul.f32 0.032258064, %v37_v17 }
 0x120   :  { %193 = vrsqrt.f32 %v41_v18  ;;  %vm45_vm2 = vcmp.eq.f32.partialorder %v41_v18, inf  ;;  %v48_v23 = vand.u32 2147483648, %v41_v18  ;;  %vm47_vm3 = vcmp.eq.f32.partialorder %v41_v18, 0.0 }
 0x121   :  { %v40_v19 = vpop.xlane.xlu1 %39 }
 0x122   :  { %v42_v20 = vmul.f32 0.032258064, %v40_v19 }
 0x124   :  { %195 = vrsqrt.f32 %v42_v20  ;;  %vm52_vm4 = vcmp.eq.f32.partialorder %v42_v20, inf  ;;  %v55_v29 = vand.u32 2147483648, %v42_v20  ;;  %vm54_vm5 = vcmp.eq.f32.partialorder %v42_v20, 0.0 }
 0x12d   :  { %v194_v21 = vpop.eup %193 }
 0x12e   :  { %v44_v22 = vmul.f32 %v194_v21, %v41_v18 }
 0x130   :  { %v46_v24 = vsel %vm45_vm2, %v41_v18, %v44_v22 }
 0x131   :  { %v196_v25 = vpop.eup %195  ;;  %v49_v26 = vsel %vm47_vm3, %v48_v23, %v46_v24 }
 0x132   :  { %v57_v27 = vadd.f32 1e-06, %v49_v26  ;;  %v51_v28 = vmul.f32 %v196_v25, %v42_v20 }
 0x134   :  { %197 = vrcp.f32 %v57_v27  ;;  %v53_v30 = vsel %vm52_vm4, %v42_v20, %v51_v28 }
 0x135   :  { %v56_v31 = vsel %vm54_vm5, %v55_v29, %v53_v30 }
 0x136   :  { %v58_v32 = vadd.f32 1e-06, %v56_v31 }
 0x138   :  { %199 = vrcp.f32 %v58_v32 }
 0x141   :  { %v198_v33 = vpop.eup %197 }
 0x142   :  { %v60_v34 = vmul.f32 %v198_v33, %v31_v6 }
 0x144   :  { %v173_v35 = vpack.c.bf16 %v60_v34, %v60_v34 }
 0x145   :  { %v200_v36 = vpop.eup %199 }
 0x146   :  { %72 = vst.msk [vmem:[#allocation2] sm:$0xf] %vm71_vm6, %v173_v35  ;;  %v62_v37 = vmul.f32 %v200_v36, %v32_v10 }
 0x148   :  { %v174_v38 = vpack.c.bf16 %v62_v37, %v62_v37 }
 0x14a   :  { %73 = vst.msk [vmem:[#allocation2 + $0x4] sm:$0xf] %vm71_vm6, %v174_v38 }
 0x151   :  { %v192_v39 = vld [vmem:[#allocation2] sm:$0xff]  }
 0x152   :  { %185 = vmatmul.mubr.msk.bf16.vlgmr.msra.gmra.mxu0 %vm21_vm0, %v192_v39 }
 0x212   :  { %v142_v41 = vpop.f32.mrf.mxu0 }
 0x213   :  { %v143_v42 = vadd.f32 %v166_v40, %v142_v41 }
 0x214   :  { %v186_v43 = vpop.f32.mrf.mxu0 }
 0x215   :  { %v175_v44 = vpack.c.bf16 %v143_v42, %v143_v42 }
 0x216   :  { %v145_v45 = vpop.f32.mrf.mxu0 }
 0x217   :  { %158 = vst.msk [vmem:[%s256_s3] sm:$0xf] %vm71_vm6, %v175_v44  ;;  %v146_v46 = vadd.f32 %v166_v40, %v145_v45 }
 0x218   :  { %v187_v47 = vpop.f32.mrf.mxu0 }
 0x219   :  { %v176_v48 = vpack.c.bf16 %v146_v46, %v146_v46 }
 0x21b   :  { %159 = vst.msk [vmem:[%s256_s3 + $0x4] sm:$0xf] %vm71_vm6, %v176_v48 }

// kernel: decoder_block.11
= control target key start
LH: loop header
LB: loop body
LE: loop exit
PB: predicated region body
PF: predicated region fallthrough
CT: control target
= control target key end

     0   :  { %v124_v0 = vmov 0.0   ;;  %vm125_vm0 = vmmov 0   ;;  %vm48_vm1 = vcmask 261120   ;;  %s178_s1 = inlined_call_operand.vmem [shape: bf16[32,32], index: 1, kind: input, shape index: {}]   ;;  %s179_s0 = inlined_call_operand.vmem [shape: bf16[16,32], index: 0, kind: input, shape index: {}]   ;;  %s180_s2 = inlined_call_operand.vmem [shape: f32[1,32], index: 2, kind: input, shape index: {}]   ;;  %s181_s3 = inlined_call_operand.vmem [shape: f32[16,32], index: 3, kind: input, shape index: {}]   ;;  %s182_s4 = inlined_call_operand.vmem [shape: f32[16,32], index: 4, kind: output, shape index: {}]  }
   0x1   :  { %111 = vmatprep.subr.bf16.mxu0 %v124_v0  ;;  %v121_v1 = vld [vmem:[%s178_s1 + $0x8] sm:$0xff]   ;;  %115 = vmatprep.mubr.msk.bf16.mxu0 %vm125_vm0, %v124_v0  ;;  %v122_v2 = vld [vmem:[%s178_s1] sm:$0xff]  }
   0x2   :  { %112 = vmatpush3.bf16.msra.mxu0 %v121_v1  ;;  %v123_v3 = vld [vmem:[%s179_s0] sm:$0xff]   ;;  %v94_v11 = vld [vmem:[%s181_s3 + $0x8] sm:$0xff] }
   0x3   :  { %113 = vmatprep.subr.bf16.mxu0 %v124_v0  ;;  %v103_v4 = vld [vmem:[%s180_s2] ss:$0 sm:$0xff] }
   0x4   :  { %v93_v6 = vld [vmem:[%s181_s3] sm:$0xff] }
   0x6   :  { %114 = vmatpush3.bf16.msra.mxu0 %v122_v2 }
   0x9   :  { %116 = vmatmul.mubr.msk.bf16.vlgmr.msra.gmra.mxu0 %vm48_vm1, %v123_v3 }
  0xc9   :  { %v86_v5 = vpop.f32.mrf.mxu0 }
  0xca   :  { %v87_v7 = vadd.f32 %v103_v4, %v86_v5 }
  0xcb   :  { %v117_v8 = vpop.f32.mrf.mxu0 }
  0xcc   :  { %v95_v9 = vadd.f32 %v93_v6, %v87_v7 }
  0xcd   :  { %v89_v10 = vpop.f32.mrf.mxu0 }
  0xce   :  { %97 = vst.msk [vmem:[%s182_s4] sm:$0xff] %vm48_vm1, %v95_v9  ;;  %v90_v12 = vadd.f32 %v103_v4, %v89_v10 }
  0xcf   :  { %v118_v13 = vpop.f32.mrf.mxu0 }
  0xd0   :  { %v96_v14 = vadd.f32 %v94_v11, %v90_v12 }
  0xd2   :  { %98 = vst.msk [vmem:[%s182_s4 + $0x8] sm:$0xff] %vm48_vm1, %v96_v14 }

// kernel: decoder_block.9
= control target key start
LH: loop header
LB: loop body
LE: loop exit
PB: predicated region body
PF: predicated region fallthrough
CT: control target
= control target key end

     0   :  { %8 = vsyncpa [#allocation4], 0  ;;  %s237_s12 = smov [#allocation3]   ;;  %s286_s0 = inlined_call_operand.vmem [shape: f32[16,32], index: 0, kind: input, shape index: {}]   ;;  %s287_s1 = inlined_call_operand.vmem [shape: bf16[32,96], index: 1, kind: input, shape index: {}]   ;;  %s288_s2 = inlined_call_operand.hbm [shape: f32[1,96], index: 2, kind: input, shape index: {}]   ;;  %s289_s3 = inlined_call_operand.vmem [shape: bf16[16,96], index: 3, kind: output, shape index: {}]  }
   0x1   :  { %s19_s13 = sshll.u32 %s237_s12, 4  ;;  %s20_s13 = int_to_ptr.vmem [resolvable:$true] %s19_s13 }
   0x2   :  { %s223_s14 = scalar_lea.vmem %s20_s13, 16  ;;  %s227_s15 = scalar_lea.vmem %s20_s13, 32 }
   0x3   :  { %p224_p0 = scmp.ne.s32.totalorder %s20_s13, %s223_s14  ;;  %p228_p1 = scmp.lt.s32.totalorder %s20_s13, %s20_s13 }
   0x4   :  { %p229_p2 = scmp.lt.s32.totalorder %s227_s15, %s223_s14 }
   0x6   :  { %p230_p3 = por %p229_p2, %p228_p1 }
   0x8   :  { %p231_p4 = pnand %p230_p3, %p224_p0 }
   0xa   :  { %234 = shalt.err (!%p231_p4)
}
   0xb   :  { %22 = dma.hbm_to_vmem [thread:$0]  %s288_s2, 16, %s20_s13, [#allocation4]  }
   0xc   :  { %235 = dma.done.wait [#allocation4], 16  }
   0xd   :  { %236 = vsyncadd [#allocation4], 4294967280  ;;  %vm33_vm0 = vcmask 261120   ;;  %v31_v0 = vld [vmem:[%s286_s0] sm:$0xff]  ;;  %v32_v1 = vld [vmem:[%s286_s0 + $0x8] sm:$0xff]  ;;  %v238_v15 = vmov 0.0  }
   0xe   :  { %v34_v2 = vsel %vm33_vm0, %v31_v0, 0.0  ;;  %v37_v3 = vsel %vm33_vm0, %v32_v1, 0.0  ;;  %v204_v14 = vld [vmem:[%s287_s1 + $0x8] sm:$0xff]   ;;  %193 = vmatprep.subr.bf16.mxu0 %v238_v15  ;;  %vm239_vm1 = vmmov 0   ;;  %v205_v16 = vld [vmem:[%s287_s1] sm:$0xff]   ;;  %vm83_vm6 = vcmask 257024  }
   0xf   :  { %35 = vadd.xlane.f32.xlu0 %v34_v2  ;;  %197 = vmatprep.mubr.msk.bf16.mxu0 %vm239_vm1, %v238_v15  ;;  %v179_v40 = vld [vmem:[#allocation3] ss:$0 sm:$0xff]  ;;  %vm169_vm7 = vcmask 781312  }
  0x10   :  { %194 = vmatpush3.bf16.msra.mxu0 %v204_v14 }
  0x11   :  { %195 = vmatprep.subr.bf16.mxu0 %v238_v15 }
  0x13   :  { %38 = vadd.xlane.f32.xlu0 %v37_v3 }
  0x14   :  { %196 = vmatpush3.bf16.msra.mxu0 %v205_v16 }
  0x98   :  { %v36_v4 = vpop.xlane.xlu0 %35 }
  0x99   :  { %v41_v5 = vmul.f32 0.03125, %v36_v4 }
  0x9b   :  { %v43_v6 = vsub.f32 %v31_v0, %v41_v5 }
  0x9c   :  { %v39_v7 = vpop.xlane.xlu0 %38 }
  0x9d   :  { %v42_v8 = vmul.f32 0.03125, %v39_v7  ;;  %v45_v9 = vmul.f32 %v43_v6, %v43_v6 }
  0x9f   :  { %v44_v10 = vsub.f32 %v32_v1, %v42_v8  ;;  %v47_v11 = vsel %vm33_vm0, %v45_v9, 0.0 }
  0xa0   :  { %48 = vadd.xlane.f32.xlu1 %v47_v11 }
  0xa1   :  { %v46_v12 = vmul.f32 %v44_v10, %v44_v10 }
  0xa3   :  { %v50_v13 = vsel %vm33_vm0, %v46_v12, 0.0 }
  0xa4   :  { %51 = vadd.xlane.f32.xlu1 %v50_v13 }
 0x129   :  { %v49_v17 = vpop.xlane.xlu1 %48 }
 0x12a   :  { %v53_v18 = vmul.f32 0.032258064, %v49_v17 }
 0x12c   :  { %207 = vrsqrt.f32 %v53_v18  ;;  %vm57_vm2 = vcmp.eq.f32.partialorder %v53_v18, inf  ;;  %v60_v23 = vand.u32 2147483648, %v53_v18  ;;  %vm59_vm3 = vcmp.eq.f32.partialorder %v53_v18, 0.0 }
 0x12d   :  { %v52_v19 = vpop.xlane.xlu1 %51 }
 0x12e   :  { %v54_v20 = vmul.f32 0.032258064, %v52_v19 }
 0x130   :  { %209 = vrsqrt.f32 %v54_v20  ;;  %vm64_vm4 = vcmp.eq.f32.partialorder %v54_v20, inf  ;;  %v67_v29 = vand.u32 2147483648, %v54_v20  ;;  %vm66_vm5 = vcmp.eq.f32.partialorder %v54_v20, 0.0 }
 0x139   :  { %v208_v21 = vpop.eup %207 }
 0x13a   :  { %v56_v22 = vmul.f32 %v208_v21, %v53_v18 }
 0x13c   :  { %v58_v24 = vsel %vm57_vm2, %v53_v18, %v56_v22 }
 0x13d   :  { %v210_v25 = vpop.eup %209  ;;  %v61_v26 = vsel %vm59_vm3, %v60_v23, %v58_v24 }
 0x13e   :  { %v69_v27 = vadd.f32 1e-06, %v61_v26  ;;  %v63_v28 = vmul.f32 %v210_v25, %v54_v20 }
 0x140   :  { %211 = vrcp.f32 %v69_v27  ;;  %v65_v30 = vsel %vm64_vm4, %v54_v20, %v63_v28 }
 0x141   :  { %v68_v31 = vsel %vm66_vm5, %v67_v29, %v65_v30 }
 0x142   :  { %v70_v32 = vadd.f32 1e-06, %v68_v31 }
 0x144   :  { %213 = vrcp.f32 %v70_v32 }
 0x14d   :  { %v212_v33 = vpop.eup %211 }
 0x14e   :  { %v72_v34 = vmul.f32 %v212_v33, %v43_v6 }
 0x150   :  { %v186_v35 = vpack.c.bf16 %v72_v34, %v72_v34 }
 0x151   :  { %v214_v36 = vpop.eup %213 }
 0x152   :  { %v74_v37 = vmul.f32 %v214_v36, %v44_v10  ;;  %84 = vst.msk [vmem:[#allocation2] sm:$0xf] %vm83_vm6, %v186_v35 }
 0x154   :  { %v187_v38 = vpack.c.bf16 %v74_v37, %v74_v37 }
 0x156   :  { %85 = vst.msk [vmem:[#allocation2 + $0x4] sm:$0xf] %vm83_vm6, %v187_v38 }
 0x15d   :  { %v206_v39 = vld [vmem:[#allocation2] sm:$0xff]  }
 0x15e   :  { %198 = vmatmul.mubr.msk.bf16.vlgmr.msra.gmra.mxu0 %vm33_vm0, %v206_v39 }
 0x21e   :  { %v154_v41 = vpop.f32.mrf.mxu0 }
 0x21f   :  { %v155_v42 = vadd.f32 %v179_v40, %v154_v41 }
 0x220   :  { %v199_v43 = vpop.f32.mrf.mxu0 }
 0x221   :  { %v188_v44 = vpack.c.bf16 %v155_v42, %v155_v42 }
 0x222   :  { %v157_v45 = vpop.f32.mrf.mxu0 }
 0x223   :  { %170 = vst.msk [vmem:[%s289_s3] sm:$0xf] %vm169_vm7, %v188_v44  ;;  %v158_v46 = vadd.f32 %v179_v40, %v157_v45 }
 0x224   :  { %v200_v47 = vpop.f32.mrf.mxu0 }
 0x225   :  { %v189_v48 = vpack.c.bf16 %v158_v46, %v158_v46 }
 0x227   :  { %171 = vst.msk [vmem:[%s289_s3 + $0x4] sm:$0xf] %vm169_vm7, %v189_v48 }
 0x228   :  { %176 = vsyncpa [#allocation4], 1 }

// kernel: decoder_block.10
= control target key start
LH: loop header
LB: loop body
LE: loop exit
PB: predicated region body
PF: predicated region fallthrough
CT: control target
= control target key end

     0   :  { %s900_s9 = smov 0   ;;  %s1007_s0 = inlined_call_operand.vmem [shape: bf16[2,8,96], index: 0, kind: input, shape index: {}]   ;;  %s1008_s1 = inlined_call_operand.vmem [shape: s32[2,1,8], index: 1, kind: input, shape index: {}]   ;;  %s1009_s2 = inlined_call_operand.vmem [shape: bf16[2,8,32], index: 2, kind: output, shape index: {}]  }
   0x1 LB: > { %s726_s10 = sadd.s32 4294967295, %s867_s9   ;;  %p730_p0 = scmp.ge.s32.totalorder %s867_s9, 1  ;;  %s867_s9 = sphi %s900_s9, %s12_s9  }
   0x2   : > { %p119_p1 = scmp.lt.s32.totalorder %s867_s9, 3 }
   0x4   : > { %p120_p2 = pnand %p730_p0, %p119_p1 }
   0x5   : > { %p142_p3 = scmp.lt.s32.totalorder (!%p120_p2), %s726_s10, 1  ;;  %s871_s15 = smov (!%p120_p2), 96  }
   0x6   : > { %123 = sbr.rel (%p120_p2) target bundleno = 1538 (0x602), region = 28  ;;  %s872_s16 = smov (!%p120_p2), 64  }
   0x7   : > { %s873_s17 = smov (!%p120_p2), 88   ;;  %s874_s21 = smov (!%p120_p2), 72  }
   0x8   : > { %s875_s22 = smov (!%p120_p2), 120   ;;  %s876_s23 = smov (!%p120_p2), 80  }
   0x9   : > { %s877_s24 = smov (!%p120_p2), 112   ;;  %s878_s25 = smov (!%p120_p2), 104  }
   0xa   : > { %s879_s29 = smov (!%p120_p2), 56   ;;  %s880_s30 = smov (!%p120_p2), 48  }
   0xb   : > { %v869_v0 = vmov 0.0   ;;  %vm870_vm0 = vmmov 0   ;;  %s1011_s10 = smov (!%p142_p3, %s726_s10), 1  ;;  %vm172_vm1 = vcmask 64512   ;;  %v162_v10 = vlaneseq  ;;  %s881_s3 = smov 40  }
   0xc   : > { %769 = vmatprep.subr.bf16.mxu0 %v869_v0  ;;  %771 = vmatprep.mubr.msk.bf16.mxu0 %vm870_vm0, %v869_v0  ;;  %s731_s11 = sshll.u32 %s1011_s10, 2  ;;  %s148_s20 = scalar_lea.vmem %s1008_s1, %s1011_s10  ;;  %vm236_vm3 = vcmask 1043456   ;;  %vm281_vm4 = vcmask 60416   ;;  %vm408_vm5 = vcmask 126016   ;;  %vm535_vm6 = vcmask 191616  }
   0xd   : > { %775 = vmatprep.subr.bf16.mxu1 %v869_v0  ;;  %777 = vmatprep.mubr.msk.bf16.mxu1 %vm870_vm0, %v869_v0  ;;  %s922_s14 = scalar_lea.vmem %s1007_s0, %s731_s11  ;;  %v154_v11 = vld [vmem:[%s148_s20] sm:$0x1]  ;;  %v163_v12 = vshrl.u32 %v162_v10, 7  ;;  %s974_s28 = scalar_lea.vmem %s1009_s2, %s731_s11  ;;  %vm662_vm7 = vcmask 257216  }
   0xe   : > { %v157_v1 = vld [vmem:[%s922_s14] sm:$0xf]  ;;  %vm155_vm2 = vcmp.eq.s32.totalorder %v154_v11, 0  ;;  %s882_s4 = smov 8   ;;  %s883_s5 = smov 16  }
   0xf   : > { %v733_v2 = vcombine.low %v157_v1, %v157_v1  ;;  %v158_v3 = vunpack.c.l.bf16 %v157_v1  ;;  %v283_v8 = vld [vmem:[%s922_s14] sm:$0xf]  ;;  %v164_v13 = vsub.s32 0, %v163_v12  ;;  %v156_v14 = vsel %vm155_vm2, -1e+30, %v869_v0  ;;  %s884_s6 = smov 24  }
  0x10   : > { %v931_v9 = vcombine.low %v283_v8, %v283_v8  ;;  %v537_v22 = vld [vmem:[%s922_s14] sm:$0xf]  ;;  %v284_v31 = vunpack.c.l.bf16 %v283_v8 }
  0x11   : > { %170 = vrot.lane.b32.xlu0 %v733_v2, %s871_s15  ;;  %v159_v5 = vmul.f32 0.35355338, %v158_v3  ;;  %231 = vrot.lane.b32.xlu1 %v733_v2, %s872_s16  ;;  %v939_v15 = vrot.slane %v156_v14, %v164_v13  ;;  %v944_v23 = vcombine.low %v537_v22, %v537_v22  ;;  %v410_v33 = vld [vmem:[%s922_s14] sm:$0xf]  ;;  %v538_v38 = vunpack.c.l.bf16 %v537_v22 }
  0x12   : > { %v285_v32 = vmul.f32 0.35355338, %v284_v31  ;;  %v411_v35 = vunpack.c.l.bf16 %v410_v33  ;;  %v951_v36 = vcombine.low %v410_v33, %v410_v33 }
  0x13   : > { %v160_v7 = vpack.c.bf16 %v159_v5, %v159_v5  ;;  %v539_v40 = vmul.f32 0.35355338, %v538_v38 }
  0x14   : > { %v286_v34 = vpack.c.bf16 %v285_v32, %v285_v32  ;;  %v412_v37 = vmul.f32 0.35355338, %v411_v35 }
  0x15   : > { %293 = vrot.lane.b32.xlu1 %v931_v9, %s873_s17  ;;  %v540_v41 = vpack.c.bf16 %v539_v40, %v539_v40 }
  0x16   : > { %v413_v39 = vpack.c.bf16 %v412_v37, %v412_v37 }
  0x83   : > { %v171_v4 = vpop.permute.xlu0 %170  ;;  %v232_v24 = vpop.permute.xlu1 %231 }
  0x84   : > { %v177_v6 = vsel %vm172_vm1, %v171_v4, 0  ;;  %v238_v25 = vsel %vm236_vm3, %v232_v24, 0 }
  0x85   : > { %770 = vmatpush3.bf16.xpose.msra.mxu0 %v177_v6  ;;  %776 = vmatpush3.bf16.msra.mxu1 %v238_v25 }
  0x86   : > { %787 = vmatprep.subr.bf16.mxu0 %v869_v0  ;;  %781 = vmatprep.subr.bf16.mxu1 %v869_v0 }
  0x87   : > { %v294_v42 = vpop.permute.xlu1 %293 }
  0x88   : > { %v299_v48 = vsel %vm172_vm1, %v294_v42, 0 }
  0x8c   : > { %772 = vmatmul.mubr.msk.bf16.vlgmr.msra.gmra.mxu0 %vm172_vm1, %v160_v7 }
  0x8d   : > { %789 = vmatprep.mubr.msk.bf16.mxu0 %vm870_vm0, %v869_v0 }
 0x14c   : > { %v213_v16 = vpop.f32.mrf.mxu0 }
 0x14d   : > { %v214_v17 = vadd.f32 %v213_v16, %v939_v15 }
 0x14e   : > { %v773_v18 = vpop.f32.mrf.mxu0 }
 0x14f   : > { %v219_v19 = vsel %vm172_vm1, %v214_v17, -inf }
 0x150   : > { %220 = vmax.xlane.f32.xlu0 %v219_v19  ;;  %v216_v20 = vpop.f32.mrf.mxu0 }
 0x152   : > { %v774_v21 = vpop.f32.mrf.mxu0 }
 0x166   : > { %547 = vrot.lane.b32.xlu0 %v944_v23, %s874_s21 }
 0x1d9   : > { %v221_v26 = vpop.xlane.xlu0 %220 }
 0x1da   : > { %v222_v27 = vsub.f32 %v214_v17, %v221_v26 }
 0x1dc   : > { %v223_v28 = vmul.f32 1.442695, %v222_v27 }
 0x1dd   : > { %v548_v51 = vpop.permute.xlu0 %547 }
 0x1de   : > { %845 = vpow2.f32 %v223_v28  ;;  %v553_v53 = vsel %vm172_vm1, %v548_v51, 0 }
 0x1eb   : > { %v846_v29 = vpop.eup %845 }
 0x1ec   : > { %v225_v30 = vsel %vm172_vm1, %v846_v29, 0.0 }
 0x1ed   : > { %226 = vadd.xlane.f32.xlu1 %v225_v30 }
 0x1fe   : > { %288 = vrot.lane.b32.xlu1 %v286_v34, %s875_s22 }
 0x202   : > { %420 = vrot.lane.b32.xlu1 %v951_v36, %s876_s23 }
 0x206   : > { %415 = vrot.lane.b32.xlu1 %v413_v39, %s877_s24 }
 0x20a   : > { %542 = vrot.lane.b32.xlu1 %v540_v41, %s878_s25 }
 0x276   : > { %v227_v43 = vpop.xlane.xlu1 %226 }
 0x277   : > { %847 = vrcp.f32 %v227_v43 }
 0x27a   : > { %v289_v46 = vpop.permute.xlu1 %288 }
 0x27e   : > { %v421_v49 = vpop.permute.xlu1 %420 }
 0x27f   : > { %v426_v50 = vsel %vm172_vm1, %v421_v49, 0 }
 0x282   : > { %v416_v52 = vpop.permute.xlu1 %415 }
 0x284   : > { %v848_v44 = vpop.eup %847 }
 0x285   : > { %v229_v45 = vmul.f32 %v848_v44, %v846_v29 }
 0x286   : > { %v543_v54 = vpop.permute.xlu1 %542 }
 0x287   : > { %v230_v47 = vpack.c.bf16 %v229_v45, %v229_v45 }
 0x289   : > { %778 = vmatmul.mubr.msk.bf16.vlgmr.msra.gmra.mxu1 %vm172_vm1, %v230_v47 }
 0x28a   : > { %782 = vmatpush3.bf16.xpose.msra.mxu1 %v299_v48  ;;  %783 = vmatprep.mubr.msk.bf16.mxu1 %vm870_vm0, %v869_v0 }
 0x28b   : > { %793 = vmatprep.subr.bf16.mxu1 %v869_v0 }
 0x291   : > { %784 = vmatmul.mubr.msk.bf16.vlgmr.msra.gmra.mxu1 %vm172_vm1, %v289_v46 }
 0x292   : > { %794 = vmatpush3.bf16.xpose.msra.mxu1 %v426_v50  ;;  %795 = vmatprep.mubr.msk.bf16.mxu1 %vm870_vm0, %v869_v0 }
 0x293   : > { %805 = vmatprep.subr.bf16.mxu1 %v869_v0 }
 0x299   : > { %796 = vmatmul.mubr.msk.bf16.vlgmr.msra.gmra.mxu1 %vm172_vm1, %v416_v52 }
 0x29a   : > { %806 = vmatpush3.bf16.xpose.msra.mxu1 %v553_v53  ;;  %807 = vmatprep.mubr.msk.bf16.mxu1 %vm870_vm0, %v869_v0 }
 0x2a1   : > { %808 = vmatmul.mubr.msk.bf16.vlgmr.msra.gmra.mxu1 %vm172_vm1, %v543_v54 }
 0x349   : > { %v274_v55 = vpop.f32.mrf.mxu1 }
 0x34a   : > { %v280_v56 = vpack.c.bf16 %v274_v55, %v274_v55 }
 0x34b   : > { %v779_v57 = vpop.f32.mrf.mxu1 }
 0x34c   : > { %282 = vst.msk [vmem:[%s974_s28] sm:$0xf] %vm281_vm4, %v280_v56 }
 0x34d   : > { %v277_v58 = vpop.f32.mrf.mxu1 }
 0x34f   : > { %v780_v59 = vpop.f32.mrf.mxu1 }
 0x351   : > { %v335_v60 = vpop.f32.mrf.mxu1 }
 0x352   : > { %v336_v61 = vadd.f32 %v335_v60, %v939_v15 }
 0x353   : > { %v785_v62 = vpop.f32.mrf.mxu1 }
 0x354   : > { %v341_v63 = vsel %vm172_vm1, %v336_v61, -inf }
 0x355   : > { %342 = vmax.xlane.f32.xlu1 %v341_v63  ;;  %v338_v1 = vpop.f32.mrf.mxu1 }
 0x357   : > { %v786_v2 = vpop.f32.mrf.mxu1 }
 0x359   : > { %v462_v3 = vpop.f32.mrf.mxu1 }
 0x35a   : > { %v463_v4 = vadd.f32 %v462_v3, %v939_v15 }
 0x35b   : > { %v797_v5 = vpop.f32.mrf.mxu1 }
 0x35c   : > { %v468_v6 = vsel %vm172_vm1, %v463_v4, -inf }
 0x35d   : > { %469 = vmax.xlane.f32.xlu0 %v468_v6  ;;  %v465_v7 = vpop.f32.mrf.mxu1 }
 0x35f   : > { %v798_v8 = vpop.f32.mrf.mxu1 }
 0x361   : > { %v589_v10 = vpop.f32.mrf.mxu1 }
 0x362   : > { %v590_v11 = vadd.f32 %v589_v10, %v939_v15 }
 0x363   : > { %v809_v12 = vpop.f32.mrf.mxu1 }
 0x364   : > { %v595_v13 = vsel %vm172_vm1, %v590_v11, -inf }
 0x365   : > { %596 = vmax.xlane.f32.xlu1 %v595_v13  ;;  %v592_v14 = vpop.f32.mrf.mxu1 }
 0x367   : > { %v810_v16 = vpop.f32.mrf.mxu1 }
 0x3de   : > { %v343_v17 = vpop.xlane.xlu1 %342 }
 0x3df   : > { %v344_v18 = vsub.f32 %v336_v61, %v343_v17 }
 0x3e1   : > { %v345_v19 = vmul.f32 1.442695, %v344_v18 }
 0x3e3   : > { %849 = vpow2.f32 %v345_v19 }
 0x3e6   : > { %v470_v27 = vpop.xlane.xlu0 %469 }
 0x3e7   : > { %v471_v28 = vsub.f32 %v463_v4, %v470_v27 }
 0x3e9   : > { %v472_v29 = vmul.f32 1.442695, %v471_v28 }
 0x3ee   : > { %v597_v20 = vpop.xlane.xlu1 %596 }
 0x3ef   : > { %v598_v21 = vsub.f32 %v590_v11, %v597_v20 }
 0x3f0   : > { %v850_v22 = vpop.eup %849 }
 0x3f1   : > { %v599_v24 = vmul.f32 1.442695, %v598_v21  ;;  %v347_v25 = vsel %vm172_vm1, %v850_v22, 0.0 }
 0x3f2   : > { %348 = vadd.xlane.f32.xlu1 %v347_v25 }
 0x3f3   : > { %851 = vpow2.f32 %v599_v24 }
 0x3f4   : > { %853 = vpow2.f32 %v472_v29 }
 0x400   : > { %v852_v26 = vpop.eup %851 }
 0x401   : > { %v601_v15 = vsel %vm172_vm1, %v852_v26, 0.0  ;;  %v854_v30 = vpop.eup %853 }
 0x402   : > { %602 = vadd.xlane.f32.xlu0 %v601_v15  ;;  %v474_v31 = vsel %vm172_vm1, %v854_v30, 0.0 }
 0x403   : > { %353 = vrot.lane.b32.xlu1 %v931_v9, %s879_s29 }
 0x418   : > { %480 = vrot.lane.b32.xlu0 %v951_v36, %s880_s30 }
 0x427   : > { %475 = vadd.xlane.f32.xlu1 %v474_v31 }
 0x438   : > { %607 = vrot.lane.b32.xlu1 %v944_v23, %s881_s3 }
 0x47b   : > { %v349_v32 = vpop.xlane.xlu1 %348 }
 0x47c   : > { %855 = vrcp.f32 %v349_v32 }
 0x47f   : > { %v354_v33 = vpop.permute.xlu1 %353 }
 0x480   : > { %v359_v34 = vsel %vm236_vm3, %v354_v33, 0 }
 0x481   : > { %788 = vmatpush3.bf16.msra.mxu0 %v359_v34 }
 0x482   : > { %799 = vmatprep.subr.bf16.mxu0 %v869_v0 }
 0x489   : > { %v856_v9 = vpop.eup %855 }
 0x48a   : > { %v351_v35 = vmul.f32 %v856_v9, %v850_v22 }
 0x48b   : > { %v603_v37 = vpop.xlane.xlu0 %602 }
 0x48c   : > { %v352_v38 = vpack.c.bf16 %v351_v35, %v351_v35 }
 0x48e   : > { %790 = vmatmul.mubr.msk.bf16.vlgmr.msra.gmra.mxu0 %vm172_vm1, %v352_v38 }
 0x48f   : > { %v481_v36 = vpop.permute.xlu0 %480  ;;  %801 = vmatprep.mubr.msk.bf16.mxu0 %vm870_vm0, %v869_v0 }
 0x490   : > { %v486_v23 = vsel %vm236_vm3, %v481_v36, 0 }
 0x491   : > { %800 = vmatpush3.bf16.msra.mxu0 %v486_v23 }
 0x492   : > { %811 = vmatprep.subr.bf16.mxu0 %v869_v0 }
 0x4b0   : > { %v476_v39 = vpop.xlane.xlu1 %475 }
 0x4b1   : > { %857 = vrcp.f32 %v476_v39 }
 0x4b2   : > { %859 = vrcp.f32 %v603_v37 }
 0x4b4   : > { %v608_v41 = vpop.permute.xlu1 %607 }
 0x4b5   : > { %v613_v43 = vsel %vm236_vm3, %v608_v41, 0 }
 0x4be   : > { %v858_v40 = vpop.eup %857 }
 0x4bf   : > { %v478_v42 = vmul.f32 %v858_v40, %v854_v30  ;;  %v860_v45 = vpop.eup %859 }
 0x4c0   : > { %v605_v46 = vmul.f32 %v860_v45, %v852_v26 }
 0x4c1   : > { %v479_v44 = vpack.c.bf16 %v478_v42, %v478_v42 }
 0x4c2   : > { %v606_v47 = vpack.c.bf16 %v605_v46, %v605_v46 }
 0x4c3   : > { %802 = vmatmul.mubr.msk.bf16.vlgmr.msra.gmra.mxu0 %vm172_vm1, %v479_v44 }
 0x4c4   : > { %812 = vmatpush3.bf16.msra.mxu0 %v613_v43  ;;  %813 = vmatprep.mubr.msk.bf16.mxu0 %vm870_vm0, %v869_v0 }
 0x4cb   : > { %814 = vmatmul.mubr.msk.bf16.vlgmr.msra.gmra.mxu0 %vm172_vm1, %v606_v47 }
 0x54e   : > { %v395_v48 = vpop.f32.mrf.mxu0 }
 0x54f   : > { %v750_v49 = vpack.c.bf16 %v395_v48, %v395_v48 }
 0x550   : > { %v791_v50 = vpop.f32.mrf.mxu0 }
 0x551   : > { %405 = vrot.lane.b32.xlu1 %v750_v49, %s882_s4 }
 0x552   : > { %v398_v51 = vpop.f32.mrf.mxu0 }
 0x554   : > { %v792_v52 = vpop.f32.mrf.mxu0 }
 0x583   : > { %v522_v53 = vpop.f32.mrf.mxu0 }
 0x584   : > { %v751_v54 = vpack.c.bf16 %v522_v53, %v522_v53 }
 0x585   : > { %v803_v55 = vpop.f32.mrf.mxu0 }
 0x586   : > { %532 = vrot.lane.b32.xlu0 %v751_v54, %s883_s5 }
 0x587   : > { %v525_v56 = vpop.f32.mrf.mxu0 }
 0x589   : > { %v804_v0 = vpop.f32.mrf.mxu0 }
 0x58b   : > { %v649_v57 = vpop.f32.mrf.mxu0 }
 0x58c   : > { %v752_v58 = vpack.c.bf16 %v649_v57, %v649_v57 }
 0x58d   : > { %v815_v59 = vpop.f32.mrf.mxu0 }
 0x58e   : > { %659 = vrot.lane.b32.xlu1 %v752_v58, %s884_s6 }
 0x58f   : > { %v652_v60 = vpop.f32.mrf.mxu0 }
 0x591   : > { %v816_v61 = vpop.f32.mrf.mxu0 }
 0x5c3   : > { %v406_v62 = vpop.permute.xlu1 %405 }
 0x5c4   : > { %409 = vst.msk [vmem:[%s974_s28] sm:$0xf] %vm408_vm5, %v406_v62 }
 0x5f8   : > { %v533_v63 = vpop.permute.xlu0 %532 }
 0x5f9   : > { %536 = vst.msk [vmem:[%s974_s28] sm:$0xf] %vm535_vm6, %v533_v63 }
 0x600   : > { %v660_v1 = vpop.permute.xlu1 %659 }
 0x601   : > { %663 = vst.msk [vmem:[%s974_s28] sm:$0xf] %vm662_vm7, %v660_v1 }
 0x602 PF: > { %s12_s9 = sadd.s32 1, %s867_s9  }
 0x603   : > { %p9_p4 = scmp.ge.s32.totalorder %s12_s9, 4  }
 0x605   :  { %11 = sbr.rel (!%p9_p4) target bundleno = 1 (0x1), region = 61 }

// kernel: decoder_block.13
= control target key start
LH: loop header
LB: loop body
LE: loop exit
PB: predicated region body
PF: predicated region fallthrough
CT: control target
= control target key end

     0   :  { %vm44_vm0 = vcmask 261120   ;;  %vm116_vm1 = vcmask 519168   ;;  %s205_s1 = inlined_call_operand.vmem [shape: bf16[32,64], index: 1, kind: input, shape index: {}]   ;;  %s206_s0 = inlined_call_operand.vmem [shape: f32[32,32], index: 0, kind: input, shape index: {}]   ;;  %s207_s2 = inlined_call_operand.vmem [shape: f32[1,64], index: 2, kind: input, shape index: {}]   ;;  %s208_s3 = inlined_call_operand.vmem [shape: bf16[32,64], index: 3, kind: output, shape index: {}]  }
   0x1   :  { %v150_v0 = vld [vmem:[%s205_s1 + $0x8] sm:$0xff]   ;;  %v151_v1 = vld [vmem:[%s205_s1] sm:$0xff]   ;;  %v17_v5 = vld [vmem:[%s206_s0 + $0x10] sm:$0xff] }
   0x2   :  { %142 = vmatprep.subr.bf16.mxu0 %v150_v0  ;;  %v15_v2 = vld [vmem:[%s206_s0] sm:$0xff]  ;;  %v16_v3 = vld [vmem:[%s206_s0 + $0x8] sm:$0xff]  ;;  %v18_v6 = vld [vmem:[%s206_s0 + $0x18] sm:$0xff] }
   0x3   :  { %143 = vmatpush3.bf16.msra.mxu0 %v150_v0  ;;  %v19_v4 = vpack.c.bf16 %v16_v3, %v15_v2  ;;  %v20_v7 = vpack.c.bf16 %v18_v6, %v17_v5  ;;  %v125_v8 = vld [vmem:[%s207_s2] ss:$0 sm:$0xff] }
   0x4   :  { %144 = vmatprep.subr.bf16.mxu0 %v151_v1 }
   0x5   :  { %146 = vmatprep.mubr.msk.bf16.mxu0 %vm44_vm0, %v19_v4 }
   0x7   :  { %145 = vmatpush3.bf16.msra.mxu0 %v151_v1 }
   0xa   :  { %147 = vmatmul.mubr.msk.bf16.vlgmr.msra.gmra.mxu0 %vm44_vm0, %v20_v7 }
  0xca   :  { %v148_v9 = vpop.f32.mrf.mxu0 }
  0xcb   :  { %v94_v10 = vadd.f32 %v148_v9, %v125_v8 }
  0xcc   :  { %v85_v11 = vpop.f32.mrf.mxu0 }
  0xcd   :  { %v136_v12 = vpack.c.bf16 %v94_v10, %v94_v10  ;;  %v86_v13 = vadd.f32 %v125_v8, %v85_v11 }
  0xce   :  { %v149_v14 = vpop.f32.mrf.mxu0 }
  0xcf   :  { %119 = vst.msk [vmem:[%s208_s3 + $0x8] sm:$0xf] %vm116_vm1, %v136_v12  ;;  %v134_v15 = vpack.c.bf16 %v86_v13, %v86_v13  ;;  %v97_v16 = vadd.f32 %v149_v14, %v125_v8 }
  0xd0   :  { %v88_v17 = vpop.f32.mrf.mxu0 }
  0xd1   :  { %117 = vst.msk [vmem:[%s208_s3] sm:$0xf] %vm116_vm1, %v134_v15  ;;  %v137_v18 = vpack.c.bf16 %v97_v16, %v97_v16  ;;  %v89_v19 = vadd.f32 %v125_v8, %v88_v17 }
  0xd3   :  { %120 = vst.msk [vmem:[%s208_s3 + $0xc] sm:$0xf] %vm116_vm1, %v137_v18  ;;  %v135_v20 = vpack.c.bf16 %v89_v19, %v89_v19 }
  0xd5   :  { %118 = vst.msk [vmem:[%s208_s3 + $0x4] sm:$0xf] %vm116_vm1, %v135_v20 }

// kernel: decoder_block.14
= control target key start
LH: loop header
LB: loop body
LE: loop exit
PB: predicated region body
PF: predicated region fallthrough
CT: control target
= control target key end

     0   :  { %s1049_s12 = smov 0   ;;  %s1051_s13 = smov 0   ;;  %s1180_s0 = inlined_call_operand.vmem [shape: bf16[2,8,32], index: 0, kind: input, shape index: {}]   ;;  %s1181_s1 = inlined_call_operand.vmem [shape: bf16[2,16,64], index: 1, kind: input, shape index: {}]   ;;  %s1182_s2 = inlined_call_operand.vmem [shape: s32[2,1,16], index: 2, kind: input, shape index: {}]   ;;  %s1183_s3 = inlined_call_operand.vmem [shape: bf16[2,8,32], index: 3, kind: output, shape index: {}]  }
   0x1   :  { %s1053_s14 = smov 0  }
   0x2 LB: > { %s25_s15 = sadd.s32 1, %s1011_s13  ;;  %p847_p0 = scmp.ge.s32.totalorder %s1015_s14, 1  ;;  %s1015_s14 = sphi %s1053_s14, %s13_s14   ;;  %s1011_s13 = sphi %s1051_s13, %s1185_s13   ;;  %s1007_s12 = sphi %s1049_s12, %s1184_s12  }
   0x3   : > { %p27_p1 = scmp.ge.s32.totalorder %s25_s15, 2  ;;  %p173_p2 = scmp.lt.s32.totalorder %s1015_s14, 3 }
   0x5   : > { %s1187_s15 = smov (%p27_p1, %s25_s15), 0  ;;  %p174_p3 = pnand %p847_p0, %p173_p2 }
   0x6   : > { %p209_p4 = scmp.lt.s32.totalorder (!%p174_p3), %s1007_s12, 1  ;;  %s1019_s27 = smov (!%p174_p3), 96  }
   0x7   : > { %177 = sbr.rel (%p174_p3) target bundleno = 1377 (0x561), region = 32  ;;  %s1020_s28 = smov (!%p174_p3), 120  }
   0x8   : > { %s1021_s29 = smov (!%p174_p3), 112   ;;  %s1022_s30 = smov (!%p174_p3), 104  }
   0x9   : > { %s1023_s7 = smov (!%p174_p3), 88   ;;  %s1024_s8 = smov (!%p174_p3), 72  }
   0xa   : > { %s1025_s9 = smov (!%p174_p3), 80   ;;  %s1026_s10 = smov (!%p174_p3), 8  }
   0xb   : > { %s1027_s11 = smov (!%p174_p3), 16  }
   0xc   : > { %v1017_v0 = vmov 0.0   ;;  %vm1018_vm0 = vmmov 0   ;;  %s1189_s12 = smov (!%p209_p4, %s1007_s12), 1  ;;  %vm252_vm1 = vcmask 64512   ;;  %v242_v7 = vlaneseq }
   0xd   : > { %889 = vmatprep.subr.bf16.mxu0 %v1017_v0  ;;  %891 = vmatprep.mubr.msk.bf16.mxu0 %vm1018_vm0, %v1017_v0  ;;  %s869_s16 = sshll.u32 %s1189_s12, 3  ;;  %s848_s17 = sshll.u32 %s1189_s12, 2  ;;  %vm299_vm3 = vcmask 130048   ;;  %vm359_vm4 = vcmask 60416   ;;  %vm488_vm5 = vcmask 126016   ;;  %vm617_vm6 = vcmask 191616  }
   0xe   : > { %895 = vmatprep.subr.bf16.mxu1 %v1017_v0  ;;  %897 = vmatprep.mubr.msk.bf16.mxu1 %vm1018_vm0, %v1017_v0  ;;  %s1080_s20 = scalar_lea.vmem %s1181_s1, %s869_s16  ;;  %s1087_s23 = scalar_lea.vmem %s1180_s0, %s848_s17  ;;  %v243_v9 = vshrl.u32 %v242_v7, 7  ;;  %vm746_vm7 = vcmask 257216  }
   0xf   : > { %v973_v1 = vld [vmem:[%s1080_s20] sm:$0xff]   ;;  %s223_s26 = scalar_lea.vmem %s1182_s2, %s1189_s12  ;;  %s1144_s6 = scalar_lea.vmem %s1183_s3, %s848_s17 }
  0x10   : > { %v235_v2 = vld [vmem:[%s1087_s23] sm:$0xf]  ;;  %v257_v3 = vsel %vm252_vm1, %v973_v1, 0  ;;  %v244_v10 = vsub.s32 0, %v243_v9  ;;  %312 = vrot.lane.b32.xlu1 %v973_v1, %s1019_s27  ;;  %s1028_s12 = smov 24  }
  0x11   : > { %v236_v4 = vunpack.c.l.bf16 %v235_v2  ;;  %890 = vmatpush3.bf16.xpose.msra.mxu0 %v257_v3  ;;  %v232_v8 = vld [vmem:[%s223_s26] sm:$0x1] }
  0x12   : > { %907 = vmatprep.subr.bf16.mxu0 %v1017_v0  ;;  %vm233_vm2 = vcmp.eq.s32.totalorder %v232_v8, 0  ;;  %v1106_v19 = vld [vmem:[%s1080_s20] sm:$0xff]  }
  0x13   : > { %v237_v5 = vmul.f32 0.35355338, %v236_v4  ;;  %v234_v11 = vsel %vm233_vm2, -1e+30, %v1017_v0  ;;  %v1111_v20 = vld [vmem:[%s1080_s20] sm:$0xff]  }
  0x14   : > { %v1101_v12 = vrot.slane %v234_v11, %v244_v10  ;;  %375 = vrot.lane.b32.xlu1 %v1106_v19, %s1020_s28  ;;  %v490_v21 = vld [vmem:[%s1087_s23] sm:$0xf] }
  0x15   : > { %v238_v6 = vpack.c.bf16 %v237_v5, %v237_v5  ;;  %v619_v22 = vld [vmem:[%s1087_s23] sm:$0xf]  ;;  %v491_v23 = vunpack.c.l.bf16 %v490_v21 }
  0x16   : > { %v620_v25 = vunpack.c.l.bf16 %v619_v22  ;;  %v1117_v27 = vld [vmem:[%s1080_s20] sm:$0xff]  }
  0x17   : > { %v492_v24 = vmul.f32 0.35355338, %v491_v23  ;;  %v361_v35 = vld [vmem:[%s1087_s23] sm:$0xf] }
  0x18   : > { %892 = vmatmul.mubr.msk.bf16.vlgmr.msra.gmra.mxu0 %vm252_vm1, %v238_v6  ;;  %504 = vrot.lane.b32.xlu1 %v1111_v20, %s1021_s29  ;;  %v621_v28 = vmul.f32 0.35355338, %v620_v25  ;;  %v362_v36 = vunpack.c.l.bf16 %v361_v35 }
  0x19   : > { %909 = vmatprep.mubr.msk.bf16.mxu0 %vm1018_vm0, %v1017_v0  ;;  %v493_v26 = vpack.c.bf16 %v492_v24, %v492_v24 }
  0x1a   : > { %v622_v29 = vpack.c.bf16 %v621_v28, %v621_v28  ;;  %v363_v38 = vmul.f32 0.35355338, %v362_v36 }
  0x1c   : > { %497 = vrot.lane.b32.xlu1 %v493_v26, %s1021_s29  ;;  %v364_v39 = vpack.c.bf16 %v363_v38, %v363_v38 }
  0x20   : > { %633 = vrot.lane.b32.xlu1 %v1117_v27, %s1022_s30 }
  0x24   : > { %626 = vrot.lane.b32.xlu1 %v622_v29, %s1022_s30 }
  0x82   : > { %v313_v37 = vpop.permute.xlu1 %312 }
  0x83   : > { %896 = vmatpush3.bf16.msra.mxu1 %v313_v37 }
  0x84   : > { %901 = vmatprep.subr.bf16.mxu1 %v1017_v0 }
  0x86   : > { %v376_v42 = vpop.permute.xlu1 %375 }
  0x87   : > { %v381_v44 = vsel %vm252_vm1, %v376_v42, 0 }
  0x8a   : > { %v505_v46 = vpop.permute.xlu1 %504 }
  0x8b   : > { %v510_v49 = vsel %vm252_vm1, %v505_v46, 0 }
  0x8e   : > { %v498_v48 = vpop.permute.xlu1 %497 }
  0x92   : > { %v634_v50 = vpop.permute.xlu1 %633 }
  0x93   : > { %v639_v51 = vsel %vm252_vm1, %v634_v50, 0 }
  0x96   : > { %v627_v52 = vpop.permute.xlu1 %626 }
  0xd8   : > { %v293_v13 = vpop.f32.mrf.mxu0 }
  0xd9   : > { %v294_v14 = vadd.f32 %v293_v13, %v1101_v12 }
  0xda   : > { %v893_v15 = vpop.f32.mrf.mxu0 }
  0xdb   : > { %v300_v16 = vsel %vm299_vm3, %v294_v14, -inf }
  0xdc   : > { %301 = vmax.xlane.f32.xlu0 %v300_v16  ;;  %v296_v17 = vpop.f32.mrf.mxu0 }
  0xde   : > { %v894_v18 = vpop.f32.mrf.mxu0 }
 0x165   : > { %v302_v30 = vpop.xlane.xlu0 %301 }
 0x166   : > { %v303_v31 = vsub.f32 %v294_v14, %v302_v30 }
 0x168   : > { %v304_v32 = vmul.f32 1.442695, %v303_v31 }
 0x16a   : > { %977 = vpow2.f32 %v304_v32 }
 0x177   : > { %v978_v33 = vpop.eup %977 }
 0x178   : > { %v306_v34 = vsel %vm299_vm3, %v978_v33, 0.0 }
 0x179   : > { %307 = vadd.xlane.f32.xlu0 %v306_v34 }
 0x18f   : > { %368 = vrot.lane.b32.xlu0 %v364_v39, %s1020_s28 }
 0x202   : > { %v308_v40 = vpop.xlane.xlu0 %307 }
 0x203   : > { %979 = vrcp.f32 %v308_v40 }
 0x206   : > { %v369_v47 = vpop.permute.xlu0 %368 }
 0x210   : > { %v980_v41 = vpop.eup %979 }
 0x211   : > { %v310_v43 = vmul.f32 %v980_v41, %v978_v33 }
 0x213   : > { %v311_v45 = vpack.c.bf16 %v310_v43, %v310_v43 }
 0x215   : > { %898 = vmatmul.mubr.msk.bf16.vlgmr.msra.gmra.mxu1 %vm299_vm3, %v311_v45 }
 0x216   : > { %902 = vmatpush3.bf16.xpose.msra.mxu1 %v381_v44  ;;  %903 = vmatprep.mubr.msk.bf16.mxu1 %vm1018_vm0, %v1017_v0 }
 0x217   : > { %913 = vmatprep.subr.bf16.mxu1 %v1017_v0 }
 0x21d   : > { %904 = vmatmul.mubr.msk.bf16.vlgmr.msra.gmra.mxu1 %vm252_vm1, %v369_v47 }
 0x21e   : > { %914 = vmatpush3.bf16.xpose.msra.mxu1 %v510_v49  ;;  %915 = vmatprep.mubr.msk.bf16.mxu1 %vm1018_vm0, %v1017_v0 }
 0x21f   : > { %925 = vmatprep.subr.bf16.mxu1 %v1017_v0 }
 0x225   : > { %916 = vmatmul.mubr.msk.bf16.vlgmr.msra.gmra.mxu1 %vm252_vm1, %v498_v48 }
 0x226   : > { %926 = vmatpush3.bf16.xpose.msra.mxu1 %v639_v51  ;;  %927 = vmatprep.mubr.msk.bf16.mxu1 %vm1018_vm0, %v1017_v0 }
 0x22d   : > { %928 = vmatmul.mubr.msk.bf16.vlgmr.msra.gmra.mxu1 %vm252_vm1, %v627_v52 }
 0x2d5   : > { %v352_v53 = vpop.f32.mrf.mxu1 }
 0x2d6   : > { %v358_v54 = vpack.c.bf16 %v352_v53, %v352_v53 }
 0x2d7   : > { %v899_v55 = vpop.f32.mrf.mxu1 }
 0x2d8   : > { %360 = vst.msk [vmem:[%s1144_s6] sm:$0xf] %vm359_vm4, %v358_v54 }
 0x2d9   : > { %v355_v56 = vpop.f32.mrf.mxu1 }
 0x2db   : > { %v900_v57 = vpop.f32.mrf.mxu1 }
 0x2dd   : > { %v417_v58 = vpop.f32.mrf.mxu1 }
 0x2de   : > { %v418_v59 = vadd.f32 %v417_v58, %v1101_v12 }
 0x2df   : > { %v905_v60 = vpop.f32.mrf.mxu1 }
 0x2e0   : > { %v423_v61 = vsel %vm299_vm3, %v418_v59, -inf }
 0x2e1   : > { %424 = vmax.xlane.f32.xlu1 %v423_v61  ;;  %v420_v62 = vpop.f32.mrf.mxu1 }
 0x2e3   : > { %v906_v63 = vpop.f32.mrf.mxu1 }
 0x2e5   : > { %v546_v1 = vpop.f32.mrf.mxu1 }
 0x2e6   : > { %v547_v2 = vadd.f32 %v546_v1, %v1101_v12 }
 0x2e7   : > { %v917_v3 = vpop.f32.mrf.mxu1 }
 0x2e8   : > { %v552_v4 = vsel %vm299_vm3, %v547_v2, -inf }
 0x2e9   : > { %553 = vmax.xlane.f32.xlu0 %v552_v4  ;;  %v549_v5 = vpop.f32.mrf.mxu1 }
 0x2eb   : > { %v918_v6 = vpop.f32.mrf.mxu1 }
 0x2ed   : > { %v675_v7 = vpop.f32.mrf.mxu1 }
 0x2ee   : > { %v676_v8 = vadd.f32 %v675_v7, %v1101_v12 }
 0x2ef   : > { %v929_v9 = vpop.f32.mrf.mxu1 }
 0x2f0   : > { %v681_v10 = vsel %vm299_vm3, %v676_v8, -inf }
 0x2f1   : > { %682 = vmax.xlane.f32.xlu1 %v681_v10  ;;  %v678_v11 = vpop.f32.mrf.mxu1 }
 0x2f3   : > { %v930_v13 = vpop.f32.mrf.mxu1 }
 0x302   : > { %435 = vrot.lane.b32.xlu1 %v1106_v19, %s1023_s7 }
 0x36a   : > { %v425_v14 = vpop.xlane.xlu1 %424 }
 0x36b   : > { %v426_v15 = vsub.f32 %v418_v59, %v425_v14 }
 0x36d   : > { %v427_v16 = vmul.f32 1.442695, %v426_v15 }
 0x36f   : > { %981 = vpow2.f32 %v427_v16 }
 0x372   : > { %v554_v17 = vpop.xlane.xlu0 %553 }
 0x373   : > { %v555_v18 = vsub.f32 %v547_v2, %v554_v17 }
 0x375   : > { %v556_v21 = vmul.f32 1.442695, %v555_v18 }
 0x377   : > { %983 = vpow2.f32 %v556_v21 }
 0x37a   : > { %v683_v22 = vpop.xlane.xlu1 %682 }
 0x37b   : > { %v684_v23 = vsub.f32 %v676_v8, %v683_v22 }
 0x37c   : > { %v982_v12 = vpop.eup %981 }
 0x37d   : > { %v685_v24 = vmul.f32 1.442695, %v684_v23  ;;  %v429_v25 = vsel %vm299_vm3, %v982_v12, 0.0 }
 0x37e   : > { %430 = vadd.xlane.f32.xlu0 %v429_v25  ;;  %v436_v26 = vpop.permute.xlu1 %435 }
 0x37f   : > { %985 = vpow2.f32 %v685_v24  ;;  %908 = vmatpush3.bf16.msra.mxu0 %v436_v26 }
 0x380   : > { %919 = vmatprep.subr.bf16.mxu0 %v1017_v0 }
 0x384   : > { %v984_v19 = vpop.eup %983 }
 0x385   : > { %v558_v28 = vsel %vm299_vm3, %v984_v19, 0.0 }
 0x386   : > { %559 = vadd.xlane.f32.xlu1 %v558_v28 }
 0x38c   : > { %v986_v29 = vpop.eup %985 }
 0x38d   : > { %v687_v30 = vsel %vm299_vm3, %v986_v29, 0.0 }
 0x38e   : > { %688 = vadd.xlane.f32.xlu0 %v687_v30 }
 0x397   : > { %693 = vrot.lane.b32.xlu1 %v1117_v27, %s1024_s8 }
 0x3a4   : > { %564 = vrot.lane.b32.xlu0 %v1111_v20, %s1025_s9 }
 0x407   : > { %v431_v31 = vpop.xlane.xlu0 %430 }
 0x408   : > { %987 = vrcp.f32 %v431_v31 }
 0x40f   : > { %v560_v32 = vpop.xlane.xlu1 %559 }
 0x410   : > { %989 = vrcp.f32 %v560_v32 }
 0x413   : > { %v694_v39 = vpop.permute.xlu1 %693 }
 0x415   : > { %v988_v33 = vpop.eup %987 }
 0x416   : > { %v433_v34 = vmul.f32 %v988_v33, %v982_v12 }
 0x417   : > { %v689_v35 = vpop.xlane.xlu0 %688 }
 0x418   : > { %991 = vrcp.f32 %v689_v35  ;;  %v434_v36 = vpack.c.bf16 %v433_v34, %v433_v34 }
 0x41a   : > { %910 = vmatmul.mubr.msk.bf16.vlgmr.msra.gmra.mxu0 %vm299_vm3, %v434_v36 }
 0x41b   : > { %v565_v37 = vpop.permute.xlu0 %564  ;;  %921 = vmatprep.mubr.msk.bf16.mxu0 %vm1018_vm0, %v1017_v0 }
 0x41c   : > { %920 = vmatpush3.bf16.msra.mxu0 %v565_v37 }
 0x41d   : > { %v990_v27 = vpop.eup %989  ;;  %931 = vmatprep.subr.bf16.mxu0 %v1017_v0 }
 0x41e   : > { %v562_v20 = vmul.f32 %v990_v27, %v984_v19 }
 0x420   : > { %v563_v38 = vpack.c.bf16 %v562_v20, %v562_v20 }
 0x422   : > { %922 = vmatmul.mubr.msk.bf16.vlgmr.msra.gmra.mxu0 %vm299_vm3, %v563_v38 }
 0x423   : > { %932 = vmatpush3.bf16.msra.mxu0 %v694_v39  ;;  %933 = vmatprep.mubr.msk.bf16.mxu0 %vm1018_vm0, %v1017_v0 }
 0x425   : > { %v992_v40 = vpop.eup %991 }
 0x426   : > { %v691_v41 = vmul.f32 %v992_v40, %v986_v29 }
 0x428   : > { %v692_v42 = vpack.c.bf16 %v691_v41, %v691_v41 }
 0x42a   : > { %934 = vmatmul.mubr.msk.bf16.vlgmr.msra.gmra.mxu0 %vm299_vm3, %v692_v42 }
 0x4da   : > { %v475_v43 = vpop.f32.mrf.mxu0 }
 0x4db   : > { %v870_v44 = vpack.c.bf16 %v475_v43, %v475_v43 }
 0x4dc   : > { %v911_v45 = vpop.f32.mrf.mxu0 }
 0x4dd   : > { %485 = vrot.lane.b32.xlu1 %v870_v44, %s1026_s10 }
 0x4de   : > { %v478_v46 = vpop.f32.mrf.mxu0 }
 0x4e0   : > { %v912_v47 = vpop.f32.mrf.mxu0 }
 0x4e2   : > { %v604_v48 = vpop.f32.mrf.mxu0 }
 0x4e3   : > { %v871_v49 = vpack.c.bf16 %v604_v48, %v604_v48 }
 0x4e4   : > { %v923_v50 = vpop.f32.mrf.mxu0 }
 0x4e5   : > { %614 = vrot.lane.b32.xlu0 %v871_v49, %s1027_s11 }
 0x4e6   : > { %v607_v0 = vpop.f32.mrf.mxu0 }
 0x4e8   : > { %v924_v51 = vpop.f32.mrf.mxu0 }
 0x4ea   : > { %v733_v52 = vpop.f32.mrf.mxu0 }
 0x4eb   : > { %v872_v53 = vpack.c.bf16 %v733_v52, %v733_v52 }
 0x4ec   : > { %v935_v54 = vpop.f32.mrf.mxu0 }
 0x4ed   : > { %743 = vrot.lane.b32.xlu1 %v872_v53, %s1028_s12 }
 0x4ee   : > { %v736_v55 = vpop.f32.mrf.mxu0 }
 0x4f0   : > { %v936_v56 = vpop.f32.mrf.mxu0 }
 0x54f   : > { %v486_v57 = vpop.permute.xlu1 %485 }
 0x550   : > { %489 = vst.msk [vmem:[%s1144_s6] sm:$0xf] %vm488_vm5, %v486_v57 }
 0x557   : > { %v615_v58 = vpop.permute.xlu0 %614 }
 0x558   : > { %618 = vst.msk [vmem:[%s1144_s6] sm:$0xf] %vm617_vm6, %v615_v58 }
 0x55f   : > { %v744_v59 = vpop.permute.xlu1 %743 }
 0x560   : > { %747 = vst.msk [vmem:[%s1144_s6] sm:$0xf] %vm746_vm7, %v744_v59 }
 0x561 PF: > { %s13_s14 = sadd.s32 1, %s1015_s14   ;;  %s1184_s12 = smov %s1011_s13 }
 0x562   : > { %p10_p5 = scmp.ge.s32.totalorder %s13_s14, 4   ;;  %s1185_s13 = smov %s1187_s15 }
 0x564   :  { %12 = sbr.rel (!%p10_p5) target bundleno = 2 (0x2), region = 68 }

// kernel: decoder_block.16
= control target key start
LH: loop header
LB: loop body
LE: loop exit
PB: predicated region body
PF: predicated region fallthrough
CT: control target
= control target key end

     0   :  { %vm21_vm0 = vcmask 261120   ;;  %v203_v15 = vmov 0.0   ;;  %vm204_vm1 = vmmov 0   ;;  %vm71_vm6 = vcmask 257024   ;;  %s251_s0 = inlined_call_operand.vmem [shape: f32[16,32], index: 0, kind: input, shape index: {}]   ;;  %s252_s1 = inlined_call_operand.vmem [shape: bf16[32,64], index: 1, kind: input, shape index: {}]   ;;  %s253_s2 = inlined_call_operand.vmem [shape: f32[1,64], index: 2, kind: input, shape index: {}]   ;;  %s254_s3 = inlined_call_operand.vmem [shape: bf16[16,64], index: 3, kind: output, shape index: {}]  }
   0x1   :  { %v19_v0 = vld [vmem:[%s251_s0] sm:$0xff]  ;;  %v20_v1 = vld [vmem:[%s251_s0 + $0x8] sm:$0xff]  ;;  %182 = vmatprep.subr.bf16.mxu0 %v203_v15  ;;  %186 = vmatprep.mubr.msk.bf16.mxu0 %vm204_vm1, %v203_v15  ;;  %vm159_vm7 = vcmask 519168  }
   0x2   :  { %v22_v2 = vsel %vm21_vm0, %v19_v0, 0.0  ;;  %v25_v3 = vsel %vm21_vm0, %v20_v1, 0.0  ;;  %v192_v14 = vld [vmem:[%s252_s1 + $0x8] sm:$0xff]   ;;  %v193_v16 = vld [vmem:[%s252_s1] sm:$0xff]  }
   0x3   :  { %23 = vadd.xlane.f32.xlu0 %v22_v2  ;;  %183 = vmatpush3.bf16.msra.mxu0 %v192_v14  ;;  %v168_v40 = vld [vmem:[%s253_s2] ss:$0 sm:$0xff] }
   0x4   :  { %184 = vmatprep.subr.bf16.mxu0 %v203_v15 }
   0x7   :  { %26 = vadd.xlane.f32.xlu0 %v25_v3  ;;  %185 = vmatpush3.bf16.msra.mxu0 %v193_v16 }
  0x8c   :  { %v24_v4 = vpop.xlane.xlu0 %23 }
  0x8d   :  { %v29_v5 = vmul.f32 0.03125, %v24_v4 }
  0x8f   :  { %v31_v6 = vsub.f32 %v19_v0, %v29_v5 }
  0x90   :  { %v27_v7 = vpop.xlane.xlu0 %26 }
  0x91   :  { %v30_v8 = vmul.f32 0.03125, %v27_v7  ;;  %v33_v9 = vmul.f32 %v31_v6, %v31_v6 }
  0x93   :  { %v32_v10 = vsub.f32 %v20_v1, %v30_v8  ;;  %v35_v11 = vsel %vm21_vm0, %v33_v9, 0.0 }
  0x94   :  { %36 = vadd.xlane.f32.xlu1 %v35_v11 }
  0x95   :  { %v34_v12 = vmul.f32 %v32_v10, %v32_v10 }
  0x97   :  { %v38_v13 = vsel %vm21_vm0, %v34_v12, 0.0 }
  0x98   :  { %39 = vadd.xlane.f32.xlu1 %v38_v13 }
 0x11d   :  { %v37_v17 = vpop.xlane.xlu1 %36 }
 0x11e   :  { %v41_v18 = vmul.f32 0.032258064, %v37_v17 }
 0x120   :  { %195 = vrsqrt.f32 %v41_v18  ;;  %vm45_vm2 = vcmp.eq.f32.partialorder %v41_v18, inf  ;;  %v48_v23 = vand.u32 2147483648, %v41_v18  ;;  %vm47_vm3 = vcmp.eq.f32.partialorder %v41_v18, 0.0 }
 0x121   :  { %v40_v19 = vpop.xlane.xlu1 %39 }
 0x122   :  { %v42_v20 = vmul.f32 0.032258064, %v40_v19 }
 0x124   :  { %197 = vrsqrt.f32 %v42_v20  ;;  %vm52_vm4 = vcmp.eq.f32.partialorder %v42_v20, inf  ;;  %v55_v29 = vand.u32 2147483648, %v42_v20  ;;  %vm54_vm5 = vcmp.eq.f32.partialorder %v42_v20, 0.0 }
 0x12d   :  { %v196_v21 = vpop.eup %195 }
 0x12e   :  { %v44_v22 = vmul.f32 %v196_v21, %v41_v18 }
 0x130   :  { %v46_v24 = vsel %vm45_vm2, %v41_v18, %v44_v22 }
 0x131   :  { %v198_v25 = vpop.eup %197  ;;  %v49_v26 = vsel %vm47_vm3, %v48_v23, %v46_v24 }
 0x132   :  { %v57_v27 = vadd.f32 1e-06, %v49_v26  ;;  %v51_v28 = vmul.f32 %v198_v25, %v42_v20 }
 0x134   :  { %199 = vrcp.f32 %v57_v27  ;;  %v53_v30 = vsel %vm52_vm4, %v42_v20, %v51_v28 }
 0x135   :  { %v56_v31 = vsel %vm54_vm5, %v55_v29, %v53_v30 }
 0x136   :  { %v58_v32 = vadd.f32 1e-06, %v56_v31 }
 0x138   :  { %201 = vrcp.f32 %v58_v32 }
 0x141   :  { %v200_v33 = vpop.eup %199 }
 0x142   :  { %v60_v34 = vmul.f32 %v200_v33, %v31_v6 }
 0x144   :  { %v175_v35 = vpack.c.bf16 %v60_v34, %v60_v34 }
 0x145   :  { %v202_v36 = vpop.eup %201 }
 0x146   :  { %72 = vst.msk [vmem:[#allocation2] sm:$0xf] %vm71_vm6, %v175_v35  ;;  %v62_v37 = vmul.f32 %v202_v36, %v32_v10 }
 0x148   :  { %v176_v38 = vpack.c.bf16 %v62_v37, %v62_v37 }
 0x14a   :  { %73 = vst.msk [vmem:[#allocation2 + $0x4] sm:$0xf] %vm71_vm6, %v176_v38 }
 0x151   :  { %v194_v39 = vld [vmem:[#allocation2] sm:$0xff]  }
 0x152   :  { %187 = vmatmul.mubr.msk.bf16.vlgmr.msra.gmra.mxu0 %vm21_vm0, %v194_v39 }
 0x212   :  { %v142_v41 = vpop.f32.mrf.mxu0 }
 0x213   :  { %v143_v42 = vadd.f32 %v168_v40, %v142_v41 }
 0x214   :  { %v188_v43 = vpop.f32.mrf.mxu0 }
 0x215   :  { %v149_v44 = vmax.f32 %v143_v42, 0.0 }
 0x216   :  { %v145_v45 = vpop.f32.mrf.mxu0 }
 0x217   :  { %v177_v46 = vpack.c.bf16 %v149_v44, %v149_v44  ;;  %v146_v47 = vadd.f32 %v168_v40, %v145_v45 }
 0x218   :  { %v189_v48 = vpop.f32.mrf.mxu0 }
 0x219   :  { %160 = vst.msk [vmem:[%s254_s3] sm:$0xf] %vm159_vm7, %v177_v46  ;;  %v150_v49 = vmax.f32 %v146_v47, 0.0 }
 0x21b   :  { %v178_v50 = vpack.c.bf16 %v150_v49, %v150_v49 }
 0x21d   :  { %161 = vst.msk [vmem:[%s254_s3 + $0x4] sm:$0xf] %vm159_vm7, %v178_v50 }

// kernel: decoder_block.17
= control target key start
LH: loop header
LB: loop body
LE: loop exit
PB: predicated region body
PF: predicated region fallthrough
CT: control target
= control target key end

     0   :  { %v189_v1 = vmov 0.0   ;;  %vm190_vm0 = vmmov 0   ;;  %s246_s0 = inlined_call_operand.vmem [shape: bf16[16,64], index: 0, kind: input, shape index: {}]   ;;  %s247_s1 = inlined_call_operand.vmem [shape: bf16[64,32], index: 1, kind: input, shape index: {}]   ;;  %s248_s2 = inlined_call_operand.vmem [shape: f32[1,32], index: 2, kind: input, shape index: {}]   ;;  %s249_s3 = inlined_call_operand.vmem [shape: f32[16,32], index: 3, kind: input, shape index: {}]   ;;  %s250_s4 = inlined_call_operand.hbm [shape: f32[16,32], index: 4, kind: output, shape index: {}]  }
   0x1   :  { %v162_v0 = vld [vmem:[%s247_s1 + $0x18] sm:$0xff]   ;;  %145 = vmatprep.subr.bf16.mxu0 %v189_v1  ;;  %v163_v2 = vld [vmem:[%s247_s1 + $0x10] sm:$0xff]   ;;  %153 = vmatprep.mubr.msk.bf16.mxu0 %vm190_vm0, %v189_v1 }
   0x2   :  { %146 = vmatpush3.bf16.msra.mxu0 %v162_v0 }
   0x3   :  { %147 = vmatprep.subr.bf16.mxu0 %v189_v1 }
   0x4   :  { %9 = vsyncpa [#allocation3], 0  ;;  %v164_v3 = vld [vmem:[%s247_s1 + $0x8] sm:$0xff]   ;;  %v165_v4 = vld [vmem:[%s247_s1] sm:$0xff]   ;;  %vm65_vm1 = vcmask 523264   ;;  %vm114_vm2 = vcmask 261120  }
   0x5   :  { %v166_v5 = vld [vmem:[%s246_s0] sm:$0xff]   ;;  %s191_s1 = smov [#allocation2]   ;;  %v111_v13 = vld [vmem:[%s249_s3 + $0x8] sm:$0xff] }
   0x6   :  { %148 = vmatpush3.bf16.msra.mxu0 %v163_v2  ;;  %v133_v6 = vld [vmem:[%s248_s2] ss:$0 sm:$0xff]  ;;  %s122_s29 = sshll.u32 %s191_s1, 4  ;;  %s123_s29 = int_to_ptr.vmem [resolvable:$true] %s122_s29 }
   0x7   :  { %149 = vmatprep.subr.bf16.mxu0 %v189_v1  ;;  %v110_v8 = vld [vmem:[%s249_s3] sm:$0xff]  ;;  %s167_s2 = scalar_lea.vmem %s123_s29, 256  ;;  %p172_p1 = scmp.lt.s32.totalorder %s123_s29, %s123_s29 }
   0x8   :  { %p168_p0 = scmp.ne.s32.totalorder %s123_s29, %s167_s2  ;;  %p173_p2 = scmp.lt.s32.totalorder %s167_s2, %s167_s2 }
   0xa   :  { %150 = vmatpush3.bf16.msra.mxu0 %v164_v3  ;;  %p174_p3 = por %p173_p2, %p172_p1 }
   0xb   :  { %151 = vmatprep.subr.bf16.mxu0 %v189_v1 }
   0xc   :  { %p175_p4 = pnand %p174_p3, %p168_p0 }
   0xe   :  { %152 = vmatpush3.bf16.msra.mxu0 %v165_v4 }
  0x11   :  { %154 = vmatmul.mubr.msk.bf16.vlgmr.msra.gmra.mxu0 %vm65_vm1, %v166_v5 }
  0xd1   :  { %v103_v7 = vpop.f32.mrf.mxu0 }
  0xd2   :  { %v104_v9 = vadd.f32 %v133_v6, %v103_v7 }
  0xd3   :  { %v155_v10 = vpop.f32.mrf.mxu0 }
  0xd4   :  { %v112_v11 = vadd.f32 %v110_v8, %v104_v9 }
  0xd5   :  { %v106_v12 = vpop.f32.mrf.mxu0 }
  0xd6   :  { %115 = vst.msk [vmem:[#allocation2] sm:$0xff] %vm114_vm2, %v112_v11  ;;  %v107_v14 = vadd.f32 %v133_v6, %v106_v12 }
  0xd7   :  { %v156_v15 = vpop.f32.mrf.mxu0 }
  0xd8   :  { %v113_v16 = vadd.f32 %v111_v13, %v107_v14 }
  0xda   :  { %116 = vst.msk [vmem:[#allocation2 + $0x8] sm:$0xff] %vm114_vm2, %v113_v16 }
  0xdb   :  { %178 = shalt.err (!%p175_p4)
}
  0xdc   :  { %s192_s5 = smov 128   ;;  %s193_s6 = smov 8  }
  0xdd   :  { %128 = dma.vmem_to_hbm [thread:$0]  %s123_s29, 256, %s250_s4, [#allocation3], %s192_s5, %s192_s5, %s193_s6  }
  0xde   :  { %187 = dma.done.wait [#allocation3], 256  }
  0xdf   :  { %188 = vsyncadd [#allocation3], 4294967040 }
  0xe0   :  { %132 = vsyncpa [#allocation3], 1 }

</bundles_post_ra>
